<compile_context>
chip_gen: v6e
topology: v6e:2x2x1
jax: 0.10.0
libtpu: 0.0.40
codegen_flags: <defaults>
</compile_context>

<pallas_src>
import functools

import jax
import jax.numpy as jnp
from jax import lax
from jax.experimental import pallas as pl
from jax.experimental.pallas import tpu as pltpu

EPS = 1e-5


def _round_up(x, m):
    return (x + m - 1) // m * m


def _cdiv(a, b):
    return -(-a // b)


def _vmem_budget_bytes():
    """Half of physical VMEM per TensorCore, with a v7x-safe fallback."""
    phys = 64 * 1024 * 1024                       # v7x physical VMEM (fallback)
    try:
        info = pltpu.get_tpu_info()
        phys = int(getattr(info, "vmem_capacity_bytes", phys))
    except Exception:
        pass
    return int(min(max(phys // 2, 32 * 1024 * 1024), 96 * 1024 * 1024))


def _pick_tile(hw, cp, k9, budget, target=2048):
    """Largest sublane-aligned pixel tile whose working set fits `budget`."""
    # Resident weights (assume the pipeline double-buffers them) + slack.
    weights = 2 * (3 * k9 * 2 * cp * 2 + 3 * cp * cp * 2) + (2 << 20)
    # Per pixel-row: double-buffered bf16 tiles (x, out1, y, bcol) plus ~8 live
    # f32 (TILE, cp) temporaries in the worst (pass-2) kernel.
    per_row = 2 * (3 * cp * 2 + k9 * 2) + 8 * cp * 4
    cap = max(64, (budget - weights) // per_row)
    tile = int(min(target, cap))
    if hw <= tile:
        return _round_up(hw, 8)                   # single tile, sublane aligned
    align = 128 if tile >= 256 else 8
    return max(align, tile // align * align)


# --------------------------- pass 1 kernel -----------------------------------
def _pass1_kernel(x_ref, bcol_ref, xstat_ref, wsp1_ref, wc1_ref, bc1_ref,
                  out1_ref, stat_ref, *, cp, tile, hw, ntc):
    """InstanceNorm(x) -> spade1 -> relu -> conv1, plus partial out1 stats.

    x_ref    : (TILE, cp)        bf16  input features (channel padded)
    bcol_ref : (TILE, 9*Cin+1)   bf16  im2col of padded `bound` (+ ones column)
    xstat_ref: (2, cp)           f32   [mean; rstd] of x per (n, c)
    wsp1_ref : (9*Cin+1, 2*cp)   bf16  [gamma1 | beta1] conv weights (+bias row)
    wc1_ref  : (cp, cp)          bf16  1x1 conv1 weight
    bc1_ref  : (1, cp)           f32   conv1 bias
    out1_ref : (TILE, cp)        bf16  conv1 output (input of pass 2)
    stat_ref : (2, cp)           f32   per-(n, chunk) [sum; sumsq] of out1
    """
    c = pl.program_id(1)
    t = pl.program_id(2)

    st = xstat_ref[...]
    xn = (x_ref[...].astype(jnp.float32) - st[0:1, :]) * st[1:2, :]

    gb = jnp.dot(bcol_ref[...], wsp1_ref[...],
                 preferred_element_type=jnp.float32)            # (TILE, 2*cp)
    h1 = jnp.maximum(xn * gb[:, :cp] + gb[:, cp:], 0.0)         # spade1 + relu
    out1 = jnp.dot(h1.astype(jnp.bfloat16), wc1_ref[...],
                   preferred_element_type=jnp.float32) + bc1_ref[...]
    out1_ref[...] = out1.astype(out1_ref.dtype)

    # Masked per-channel sum / sum-of-squares (padded pixel rows excluded).
    rows = (c * ntc + t) * tile + lax.broadcasted_iota(jnp.int32, (tile, 1), 0)
    valid = (rows < hw).astype(jnp.float32)
    m1 = out1 * valid
    psum = jnp.sum(m1, axis=0, keepdims=True)                   # (1, cp)
    psq = jnp.sum(m1 * out1, axis=0, keepdims=True)             # (1, cp)

    @pl.when(t == 0)
    def _():
        stat_ref[0:1, :] = psum
        stat_ref[1:2, :] = psq

    @pl.when(t != 0)
    def _():
        stat_ref[0:1, :] += psum
        stat_ref[1:2, :] += psq


# --------------------------- pass 2 kernel -----------------------------------
def _pass2_kernel(o1_ref, x_ref, bcol_ref, ostat_ref, xstat_ref,
                  wsp2_ref, wspr_ref, wc2_ref, wcr_ref, bc2_ref, bcr_ref,
                  out_ref, *, cp):
    """Main: IN(out1)->spade2->relu->conv2.  Residual: IN(x)->spade_res->relu->conv_res.  Sum."""
    bcol = bcol_ref[...]

    # main branch
    so = ostat_ref[...]
    on = (o1_ref[...].astype(jnp.float32) - so[0:1, :]) * so[1:2, :]
    gb2 = jnp.dot(bcol, wsp2_ref[...], preferred_element_type=jnp.float32)
    h2 = jnp.maximum(on * gb2[:, :cp] + gb2[:, cp:], 0.0)
    y = jnp.dot(h2.astype(jnp.bfloat16), wc2_ref[...],
                preferred_element_type=jnp.float32) + bc2_ref[...]

    # residual branch (moved here from pass 1: re-reads x instead of a stored res)
    sx = xstat_ref[...]
    xn = (x_ref[...].astype(jnp.float32) - sx[0:1, :]) * sx[1:2, :]
    gbr = jnp.dot(bcol, wspr_ref[...], preferred_element_type=jnp.float32)
    hr = jnp.maximum(xn * gbr[:, :cp] + gbr[:, cp:], 0.0)
    y = y + jnp.dot(hr.astype(jnp.bfloat16), wcr_ref[...],
                    preferred_element_type=jnp.float32) + bcr_ref[...]

    out_ref[...] = y.astype(out_ref.dtype)


# ------------------------------ wrapper --------------------------------------
def resblk_spade(x_nchw, bound_nchw, params, *, tile_pixels=None):
    """ResBlkSPADE forward. NCHW in / NCHW f32 out."""
    N, Cp, H, W = x_nchw.shape
    Cin = bound_nchw.shape[1]
    HW = H * W
    cp = _round_up(Cp, 128)          # lane-dense padded channel count
    K9 = 9 * Cin + 1                 # im2col features + ones column (bias)

    budget = _vmem_budget_bytes()
    if tile_pixels is None:
        TILE = _pick_tile(HW, cp, K9, budget)
    else:
        TILE = max(8, min(tile_pixels, _round_up(HW, 8)) // 8 * 8)

    total_tiles = _cdiv(HW, TILE)
    # Pixel-axis chunks marked "parallel" in pass 1 so small-batch calls still
    # spread over both v7x TensorCores; each chunk owns `ntc` tiles.
    nc = max(1, min(max(1, 4 // N), total_tiles))
    ntc = _cdiv(total_tiles, nc)
    HWp = nc * ntc * TILE            # pixel count padded to a whole tile grid

    sw, sb, cw, cb = params          # (6,3,3,Cin,Cp) (6,Cp) (3,Cp,Cp) (3,Cp)

    # -------- per-(n,c) InstanceNorm stats of x, reduced on the NCHW input ---
    x32 = x_nchw.astype(jnp.float32)
    mu_x = jnp.mean(x32, axis=(2, 3))                               # (N, Cp)
    var_x = jnp.mean(jnp.square(x32 - mu_x[:, :, None, None]), axis=(2, 3))
    xstat = jnp.stack([mu_x, lax.rsqrt(var_x + EPS)], axis=1)       # (N, 2, Cp)
    xstat = jnp.pad(xstat, ((0, 0), (0, 0), (0, cp - Cp)))

    # single transpose + pad + cast pass over x (no f32 NHWC copy materialized)
    x_p = jnp.transpose(x_nchw, (0, 2, 3, 1)).reshape(N, HW, Cp)
    x_p = jnp.pad(x_p.astype(jnp.bfloat16),
                  ((0, 0), (0, HWp - HW), (0, cp - Cp)))

    # im2col of the tiny-channel bound map (+ ones column folding conv bias)
    b = jnp.transpose(bound_nchw, (0, 2, 3, 1)).astype(jnp.float32)  # (N,H,W,Cin)
    bp = jnp.pad(b, ((0, 0), (1, 1), (1, 1), (0, 0)))
    cols = [bp[:, dy:dy + H, dx:dx + W, :] for dy in range(3) for dx in range(3)]
    cols.append(jnp.ones((N, H, W, 1), jnp.float32))
    bcol = jnp.concatenate(cols, axis=-1).reshape(N, HW, K9)
    bcol = jnp.pad(bcol.astype(jnp.bfloat16), ((0, 0), (0, HWp - HW), (0, 0)))

    # SPADE 3x3 conv weights (+ bias row) as one matmul operand per SPADE block
    w_im = jnp.concatenate([sw.reshape(6, 9 * Cin, Cp), sb[:, None, :]], axis=1)
    w_im = jnp.pad(w_im, ((0, 0), (0, 0), (0, cp - Cp)))             # (6,K9,cp)
    wsp1 = jnp.concatenate([w_im[0], w_im[1]], axis=1).astype(jnp.bfloat16)
    wsp2 = jnp.concatenate([w_im[2], w_im[3]], axis=1).astype(jnp.bfloat16)
    wspr = jnp.concatenate([w_im[4], w_im[5]], axis=1).astype(jnp.bfloat16)

    cw_p = jnp.pad(cw, ((0, 0), (0, cp - Cp), (0, cp - Cp))).astype(jnp.bfloat16)
    cb_p = jnp.pad(cb, ((0, 0), (0, cp - Cp))).astype(jnp.float32)
    wc1, wc2, wcr = cw_p[0], cw_p[1], cw_p[2]
    bc1, bc2, bcr = cb_p[0][None, :], cb_p[1][None, :], cb_p[2][None, :]

    # -------- BlockSpecs ------------------------------------------------------
    feat = lambda n, c, t: (n, c * ntc + t, 0)     # pixel-tiled feature maps
    per_n = lambda n, c, t: (n, 0, 0)              # per-image stats (resident)
    per_nc = lambda n, c, t: (n, c, 0, 0)          # per-(image, chunk) partials
    const = lambda n, c, t: (0, 0)                 # weights (resident)

    x_spec = pl.BlockSpec((None, TILE, cp), feat)
    bcol_spec = pl.BlockSpec((None, TILE, K9), feat)
    xstat_spec = pl.BlockSpec((None, 2, cp), per_n)
    pstat_spec = pl.BlockSpec((None, None, 2, cp), per_nc)
    wsp_spec = pl.BlockSpec((K9, 2 * cp), const)
    wc_spec = pl.BlockSpec((cp, cp), const)
    b_spec = pl.BlockSpec((1, cp), const)

    grid = (N, nc, ntc)
    flops1 = 2 * N * HWp * (K9 * 2 * cp + cp * cp)
    flops2 = 2 * N * HWp * (2 * K9 * 2 * cp + 2 * cp * cp)
    bytes1 = N * HWp * (2 * cp + 2 * K9 + 2 * cp)
    bytes2 = N * HWp * (3 * 2 * cp + 2 * K9 + 2 * cp)

    # -------- pass 1: spade1 -> relu -> conv1 (+ masked out1 sum/sumsq) ------
    out1, stat1 = pl.pallas_call(
        functools.partial(_pass1_kernel, cp=cp, tile=TILE, hw=HW, ntc=ntc),
        grid_spec=pltpu.PrefetchScalarGridSpec(
            num_scalar_prefetch=0,
            grid=grid,
            in_specs=[x_spec, bcol_spec, xstat_spec, wsp_spec, wc_spec, b_spec],
            out_specs=[x_spec, pstat_spec],
        ),
        out_shape=[
            jax.ShapeDtypeStruct((N, HWp, cp), jnp.bfloat16),   # conv1 output
            jax.ShapeDtypeStruct((N, nc, 2, cp), jnp.float32),  # partial stats
        ],
        compiler_params=pltpu.CompilerParams(
            dimension_semantics=("parallel", "parallel", "arbitrary"),
            vmem_limit_bytes=budget),
        cost_estimate=pl.CostEstimate(flops=flops1, transcendentals=0,
                                      bytes_accessed=bytes1),
    )(x_p, bcol, xstat, wsp1, wc1, bc1)

    # -------- tiny stat finalize: reduce chunk partials -> mean / rstd -------
    # TODO(synk): E[x^2]-E[x]^2 in f32 can cancel for very large HW when
    # |mean| >> std; switch to a shifted accumulation if that regime shows up.
    sums = jnp.sum(stat1, axis=1)                                   # (N, 2, cp)
    inv_hw = 1.0 / float(HW)
    mu1 = sums[:, 0, :] * inv_hw
    var1 = jnp.maximum(sums[:, 1, :] * inv_hw - mu1 * mu1, 0.0)
    ostat = jnp.stack([mu1, lax.rsqrt(var1 + EPS)], axis=1)         # (N, 2, cp)

    # -------- pass 2: IN -> spade2 -> relu -> conv2  +  residual branch ------
    out_p = pl.pallas_call(
        functools.partial(_pass2_kernel, cp=cp),
        grid_spec=pltpu.PrefetchScalarGridSpec(
            num_scalar_prefetch=0,
            grid=grid,
            in_specs=[x_spec, x_spec, bcol_spec, xstat_spec, xstat_spec,
                      wsp_spec, wsp_spec, wc_spec, wc_spec, b_spec, b_spec],
            out_specs=x_spec,
        ),
        out_shape=jax.ShapeDtypeStruct((N, HWp, cp), jnp.bfloat16),
        compiler_params=pltpu.CompilerParams(
            dimension_semantics=("parallel", "parallel", "parallel"),
            vmem_limit_bytes=budget),
        cost_estimate=pl.CostEstimate(flops=flops2, transcendentals=0,
                                      bytes_accessed=bytes2),
    )(out1, x_p, bcol, ostat, xstat, wsp2, wspr, wc2, wcr, bc2, bcr)

    # bf16 NHWC-padded -> f32 NCHW in one fused XLA epilogue pass.
    # TODO(synk): downstream consumers that accept NHWC/bf16 should take
    # `out_p` directly and skip this transpose pass entirely.
    out = out_p[:, :HW, :Cp].reshape(N, H, W, Cp).astype(jnp.float32)
    return jnp.transpose(out, (0, 3, 1, 2))                          # NCHW


# ---------------- pure-JAX f32 reference (correctness check only) ------------
def _reference(x_nchw, bound_nchw, params):
    sw, sb, cw, cb = params
    x = jnp.transpose(x_nchw, (0, 2, 3, 1)).astype(jnp.float32)      # NHWC
    b = jnp.transpose(bound_nchw, (0, 2, 3, 1)).astype(jnp.float32)  # NHWC

    def inorm(t):
        mu = jnp.mean(t, axis=(1, 2), keepdims=True)
        var = jnp.mean((t - mu) ** 2, axis=(1, 2), keepdims=True)
        return (t - mu) * lax.rsqrt(var + EPS)

    def c3(i):
        y = lax.conv_general_dilated(b, sw[i], (1, 1), 'SAME',
                                     dimension_numbers=('NHWC', 'HWIO', 'NHWC'))
        return y + sb[i]

    def c1(t, i):
        return jnp.einsum('nhwc,cd->nhwd', t, cw[i]) + cb[i]

    relu = lambda t: jnp.maximum(t, 0.0)

    out = c1(relu(inorm(x) * c3(0) + c3(1)), 0)       # spade1 + relu + conv1
    out = c1(relu(inorm(out) * c3(2) + c3(3)), 1)     # spade2 + relu + conv2
    res = c1(relu(inorm(x) * c3(4) + c3(5)), 2)       # spade_res + relu + conv_res
    return jnp.transpose(out + res, (0, 3, 1, 2))


def init_params(key, input_nc, planes):
    k1, k2, k3, k4 = jax.random.split(key, 4)
    sw = 0.1 * jax.random.normal(k1, (6, 3, 3, input_nc, planes), jnp.float32)
    sb = 0.1 * jax.random.normal(k2, (6, planes), jnp.float32)
    cw = 0.1 * jax.random.normal(k3, (3, planes, planes), jnp.float32)
    cb = 0.1 * jax.random.normal(k4, (3, planes), jnp.float32)
    return sw, sb, cw, cb


if __name__ == "__main__":
    N, input_nc, planes, H, W = 2, 4, 8, 16, 16

    key = jax.random.PRNGKey(0)
    kx, kb, kp = jax.random.split(key, 3)
    x = jax.random.normal(kx, (N, planes, H, W), jnp.float32)        # NCHW
    bound = jax.random.normal(kb, (N, input_nc, H, W), jnp.float32)  # NCHW
    params = init_params(kp, input_nc, planes)

    # tile_pixels=96 -> HW=256 is padded to 384 pixels over 2 chunks x 2 tiles:
    # exercises the chunk-parallel grid, the cross-tile stat accumulation, and
    # the padded-row masking path at this small test size.
    fwd = jax.jit(functools.partial(resblk_spade, tile_pixels=96))
    out = jax.block_until_ready(fwd(x, bound, params))

    ref = _reference(x, bound, params)
    assert out.shape == (N, planes, H, W)
    err = float(jnp.max(jnp.abs(out - ref)))
    # bf16 MXU operands + bf16 intermediates/output vs an f32 reference
    assert jnp.allclose(out, ref, rtol=5e-2, atol=5e-2), f"max abs err {err}"
    print("KERNEL_OK")
</pallas_src>

<mosaic_0001>
module attributes {stable_mosaic.version = 11 : i64} {
  func.func @_pass1_kernel(%arg0: i32, %arg1: i32, %arg2: i32, %arg3: memref<1x96x128xbf16, #tpu.memory_space<vmem>>, %arg4: memref<1x96x37xbf16, #tpu.memory_space<vmem>>, %arg5: memref<1x2x128xf32, #tpu.memory_space<vmem>>, %arg6: memref<37x256xbf16, #tpu.memory_space<vmem>>, %arg7: memref<128x128xbf16, #tpu.memory_space<vmem>>, %arg8: memref<1x128xf32, #tpu.memory_space<vmem>>, %arg9: memref<1x96x128xbf16, #tpu.memory_space<vmem>>, %arg10: memref<1x1x2x128xf32, #tpu.memory_space<vmem>>) attributes {dimension_semantics = [#tpu.dimension_semantics<parallel>, #tpu.dimension_semantics<parallel>, #tpu.dimension_semantics<arbitrary>], iteration_bounds = array<i64: 2, 2, 2>, scalar_prefetch = 0 : i64, scratch_operands = 0 : i64, tpu.core_type = #tpu.core_type<tc>, window_params = [{transform_indices = @transform_0, window_bounds = array<i64: 1, 96, 128>}, {transform_indices = @transform_1, window_bounds = array<i64: 1, 96, 37>}, {transform_indices = @transform_2, window_bounds = array<i64: 1, 2, 128>}, {pipeline_mode = #tpu.pipeline_mode<synchronous>, transform_indices = @transform_3, window_bounds = array<i64: 37, 256>}, {pipeline_mode = #tpu.pipeline_mode<synchronous>, transform_indices = @transform_4, window_bounds = array<i64: 128, 128>}, {pipeline_mode = #tpu.pipeline_mode<synchronous>, transform_indices = @transform_5, window_bounds = array<i64: 1, 128>}, {transform_indices = @transform_6, window_bounds = array<i64: 1, 96, 128>}, {transform_indices = @transform_7, window_bounds = array<i64: 1, 1, 2, 128>}]} {
    %c0 = arith.constant 0 : index
    %c0_0 = arith.constant 0 : index
    %c0_1 = arith.constant 0 : index
    %0 = vector.load %arg5[%c0, %c0_0, %c0_1] : memref<1x2x128xf32, #tpu.memory_space<vmem>>, vector<1x2x128xf32>
    %1 = vector.shape_cast %0 : vector<1x2x128xf32> to vector<2x128xf32>
    %c0_2 = arith.constant 0 : index
    %c0_3 = arith.constant 0 : index
    %c0_4 = arith.constant 0 : index
    %2 = vector.load %arg3[%c0_2, %c0_3, %c0_4] : memref<1x96x128xbf16, #tpu.memory_space<vmem>>, vector<1x96x128xbf16>
    %3 = vector.shape_cast %2 : vector<1x96x128xbf16> to vector<96x128xbf16>
    %4 = arith.extf %3 : vector<96x128xbf16> to vector<96x128xf32>
    %5 = vector.extract_strided_slice %1 {offsets = [0, 0], sizes = [1, 128], strides = [1, 1]} : vector<2x128xf32> to vector<1x128xf32>
    %6 = vector.broadcast %5 : vector<1x128xf32> to vector<96x128xf32>
    %7 = arith.subf %4, %6 : vector<96x128xf32>
    %8 = vector.extract_strided_slice %1 {offsets = [1, 0], sizes = [1, 128], strides = [1, 1]} : vector<2x128xf32> to vector<1x128xf32>
    %9 = vector.broadcast %8 : vector<1x128xf32> to vector<96x128xf32>
    %10 = arith.mulf %7, %9 : vector<96x128xf32>
    %c0_5 = arith.constant 0 : index
    %c0_6 = arith.constant 0 : index
    %c0_7 = arith.constant 0 : index
    %11 = vector.load %arg4[%c0_5, %c0_6, %c0_7] : memref<1x96x37xbf16, #tpu.memory_space<vmem>>, vector<1x96x37xbf16>
    %12 = vector.shape_cast %11 : vector<1x96x37xbf16> to vector<96x37xbf16>
    %c0_8 = arith.constant 0 : index
    %c0_9 = arith.constant 0 : index
    %13 = vector.load %arg6[%c0_8, %c0_9] : memref<37x256xbf16, #tpu.memory_space<vmem>>, vector<37x256xbf16>
    %cst = arith.constant dense<0.000000e+00> : vector<96x256xf32>
    %14 = tpu.matmul %12, %13, %cst {dimension_numbers = #tpu.dot_dimension_numbers<[1], [0], [0], [1], [0, 0, 1, 1], [], []>} : vector<96x37xbf16>, vector<37x256xbf16>, vector<96x256xf32> -> vector<96x256xf32>
    %15 = vector.extract_strided_slice %14 {offsets = [0, 0], sizes = [96, 128], strides = [1, 1]} : vector<96x256xf32> to vector<96x128xf32>
    %16 = arith.mulf %10, %15 : vector<96x128xf32>
    %17 = vector.extract_strided_slice %14 {offsets = [0, 128], sizes = [96, 128], strides = [1, 1]} : vector<96x256xf32> to vector<96x128xf32>
    %18 = arith.addf %16, %17 : vector<96x128xf32>
    %cst_10 = arith.constant 0.000000e+00 : f32
    %19 = vector.broadcast %cst_10 : f32 to vector<96x128xf32>
    %20 = arith.maximumf %18, %19 : vector<96x128xf32>
    %21 = arith.truncf %20 : vector<96x128xf32> to vector<96x128xbf16>
    %c0_11 = arith.constant 0 : index
    %c0_12 = arith.constant 0 : index
    %22 = vector.load %arg7[%c0_11, %c0_12] : memref<128x128xbf16, #tpu.memory_space<vmem>>, vector<128x128xbf16>
    %cst_13 = arith.constant dense<0.000000e+00> : vector<96x128xf32>
    %23 = tpu.matmul %21, %22, %cst_13 {dimension_numbers = #tpu.dot_dimension_numbers<[1], [0], [0], [1], [0, 0, 1, 1], [], []>} : vector<96x128xbf16>, vector<128x128xbf16>, vector<96x128xf32> -> vector<96x128xf32>
    %c0_14 = arith.constant 0 : index
    %c0_15 = arith.constant 0 : index
    %24 = vector.load %arg8[%c0_14, %c0_15] : memref<1x128xf32, #tpu.memory_space<vmem>>, vector<1x128xf32>
    %25 = vector.broadcast %24 : vector<1x128xf32> to vector<96x128xf32>
    %26 = arith.addf %23, %25 : vector<96x128xf32>
    %27 = arith.truncf %26 : vector<96x128xf32> to vector<96x128xbf16>
    %c0_16 = arith.constant 0 : index
    %c0_17 = arith.constant 0 : index
    %c0_18 = arith.constant 0 : index
    %28 = vector.load %arg9[%c0_16, %c0_17, %c0_18] : memref<1x96x128xbf16, #tpu.memory_space<vmem>>, vector<1x96x128xbf16>
    %29 = vector.shape_cast %28 : vector<1x96x128xbf16> to vector<96x128xbf16>
    %30 = vector.shape_cast %27 : vector<96x128xbf16> to vector<1x96x128xbf16>
    tpu.vector_store %arg9[%c0_16, %c0_17, %c0_18], %30 {strides = array<i32>} : memref<1x96x128xbf16, #tpu.memory_space<vmem>>, vector<1x96x128xbf16>,
    %c2_i32 = arith.constant 2 : i32
    %31 = arith.muli %arg1, %c2_i32 : i32
    %32 = arith.addi %31, %arg2 : i32
    %c96_i32 = arith.constant 96 : i32
    %33 = arith.muli %32, %c96_i32 : i32
    %34 = tpu.iota {dimensions = array<i32: 0>} : vector<96x1xi32>
    %35 = vector.broadcast %33 : i32 to vector<96x1xi32>
    %36 = arith.addi %35, %34 : vector<96x1xi32>
    %c256_i32 = arith.constant 256 : i32
    %37 = vector.broadcast %c256_i32 : i32 to vector<96x1xi32>
    %38 = arith.cmpi slt, %36, %37 : vector<96x1xi32>
    %39 = arith.extui %38 : vector<96x1xi1> to vector<96x1xi32>
    %40 = arith.sitofp %39 : vector<96x1xi32> to vector<96x1xf32>
    %41 = vector.broadcast %40 : vector<96x1xf32> to vector<96x128xf32>
    %42 = arith.mulf %26, %41 : vector<96x128xf32>
    %cst_19 = arith.constant dense<0.000000e+00> : vector<128xf32>
    %43 = vector.multi_reduction <add>, %42, %cst_19 [0] : vector<96x128xf32> to vector<128xf32>
    %44 = vector.shape_cast %43 : vector<128xf32> to vector<1x128xf32>
    %45 = arith.mulf %42, %26 : vector<96x128xf32>
    %cst_20 = arith.constant dense<0.000000e+00> : vector<128xf32>
    %46 = vector.multi_reduction <add>, %45, %cst_20 [0] : vector<96x128xf32> to vector<128xf32>
    %47 = vector.shape_cast %46 : vector<128xf32> to vector<1x128xf32>
    %c0_i32 = arith.constant 0 : i32
    %48 = arith.cmpi eq, %arg2, %c0_i32 : i32
    %49 = arith.extui %48 : i1 to i32
    %c0_i32_21 = arith.constant 0 : i32
    %50 = arith.cmpi ne, %49, %c0_i32_21 : i32
    scf.if %50 {
      %c0_24 = arith.constant 0 : index
      %c0_25 = arith.constant 0 : index
      %c0_26 = arith.constant 0 : index
      %c0_27 = arith.constant 0 : index
      %54 = vector.load %arg10[%c0_24, %c0_25, %c0_26, %c0_27] : memref<1x1x2x128xf32, #tpu.memory_space<vmem>>, vector<1x1x1x128xf32>
      %55 = vector.shape_cast %54 : vector<1x1x1x128xf32> to vector<1x128xf32>
      %56 = vector.shape_cast %44 : vector<1x128xf32> to vector<1x1x1x128xf32>
      tpu.vector_store %arg10[%c0_24, %c0_25, %c0_26, %c0_27], %56 {strides = array<i32>} : memref<1x1x2x128xf32, #tpu.memory_space<vmem>>, vector<1x1x1x128xf32>,
      %c0_28 = arith.constant 0 : index
      %c0_29 = arith.constant 0 : index
      %c1 = arith.constant 1 : index
      %c0_30 = arith.constant 0 : index
      %57 = vector.load %arg10[%c0_28, %c0_29, %c1, %c0_30] : memref<1x1x2x128xf32, #tpu.memory_space<vmem>>, vector<1x1x1x128xf32>
      %58 = vector.shape_cast %57 : vector<1x1x1x128xf32> to vector<1x128xf32>
      %59 = vector.shape_cast %47 : vector<1x128xf32> to vector<1x1x1x128xf32>
      tpu.vector_store %arg10[%c0_28, %c0_29, %c1, %c0_30], %59 {strides = array<i32>} : memref<1x1x2x128xf32, #tpu.memory_space<vmem>>, vector<1x1x1x128xf32>,
    } else {
    }
    %c0_i32_22 = arith.constant 0 : i32
    %51 = arith.cmpi ne, %arg2, %c0_i32_22 : i32
    %52 = arith.extui %51 : i1 to i32
    %c0_i32_23 = arith.constant 0 : i32
    %53 = arith.cmpi ne, %52, %c0_i32_23 : i32
    scf.if %53 {
      %c0_24 = arith.constant 0 : index
      %c0_25 = arith.constant 0 : index
      %c0_26 = arith.constant 0 : index
      %c0_27 = arith.constant 0 : index
      %54 = vector.load %arg10[%c0_24, %c0_25, %c0_26, %c0_27] : memref<1x1x2x128xf32, #tpu.memory_space<vmem>>, vector<1x1x1x128xf32>
      %55 = vector.shape_cast %54 : vector<1x1x1x128xf32> to vector<1x128xf32>
      %56 = arith.addf %55, %44 : vector<1x128xf32>
      %c0_28 = arith.constant 0 : index
      %c0_29 = arith.constant 0 : index
      %c0_30 = arith.constant 0 : index
      %c0_31 = arith.constant 0 : index
      %57 = vector.load %arg10[%c0_28, %c0_29, %c0_30, %c0_31] : memref<1x1x2x128xf32, #tpu.memory_space<vmem>>, vector<1x1x1x128xf32>
      %58 = vector.shape_cast %57 : vector<1x1x1x128xf32> to vector<1x128xf32>
      %59 = vector.shape_cast %56 : vector<1x128xf32> to vector<1x1x1x128xf32>
      tpu.vector_store %arg10[%c0_28, %c0_29, %c0_30, %c0_31], %59 {strides = array<i32>} : memref<1x1x2x128xf32, #tpu.memory_space<vmem>>, vector<1x1x1x128xf32>,
      %c0_32 = arith.constant 0 : index
      %c0_33 = arith.constant 0 : index
      %c1 = arith.constant 1 : index
      %c0_34 = arith.constant 0 : index
      %60 = vector.load %arg10[%c0_32, %c0_33, %c1, %c0_34] : memref<1x1x2x128xf32, #tpu.memory_space<vmem>>, vector<1x1x1x128xf32>
      %61 = vector.shape_cast %60 : vector<1x1x1x128xf32> to vector<1x128xf32>
      %62 = arith.addf %61, %47 : vector<1x128xf32>
      %c0_35 = arith.constant 0 : index
      %c0_36 = arith.constant 0 : index
      %c1_37 = arith.constant 1 : index
      %c0_38 = arith.constant 0 : index
      %63 = vector.load %arg10[%c0_35, %c0_36, %c1_37, %c0_38] : memref<1x1x2x128xf32, #tpu.memory_space<vmem>>, vector<1x1x1x128xf32>
      %64 = vector.shape_cast %63 : vector<1x1x1x128xf32> to vector<1x128xf32>
      %65 = vector.shape_cast %62 : vector<1x128xf32> to vector<1x1x1x128xf32>
      tpu.vector_store %arg10[%c0_35, %c0_36, %c1_37, %c0_38], %65 {strides = array<i32>} : memref<1x1x2x128xf32, #tpu.memory_space<vmem>>, vector<1x1x1x128xf32>,
    } else {
    }
    return
  }
  func.func @transform_0(%arg0: i32, %arg1: i32, %arg2: i32) -> (i32, i32, i32) {
    %c2_i32 = arith.constant 2 : i32
    %0 = arith.muli %arg1, %c2_i32 : i32
    %1 = arith.addi %0, %arg2 : i32
    %c0_i32 = arith.constant 0 : i32
    %c0_i32_0 = arith.constant 0 : i32
    return %arg0, %1, %c0_i32 : i32, i32, i32
  }
  func.func @transform_1(%arg0: i32, %arg1: i32, %arg2: i32) -> (i32, i32, i32) {
    %c2_i32 = arith.constant 2 : i32
    %0 = arith.muli %arg1, %c2_i32 : i32
    %1 = arith.addi %0, %arg2 : i32
    %c0_i32 = arith.constant 0 : i32
    %c0_i32_0 = arith.constant 0 : i32
    return %arg0, %1, %c0_i32 : i32, i32, i32
  }
  func.func @transform_2(%arg0: i32, %arg1: i32, %arg2: i32) -> (i32, i32, i32) {
    %c0_i32 = arith.constant 0 : i32
    %c0_i32_0 = arith.constant 0 : i32
    %c0_i32_1 = arith.constant 0 : i32
    return %arg0, %c0_i32, %c0_i32_0 : i32, i32, i32
  }
  func.func @transform_3(%arg0: i32, %arg1: i32, %arg2: i32) -> (i32, i32) {
    %c0_i32 = arith.constant 0 : i32
    %c0_i32_0 = arith.constant 0 : i32
    %c0_i32_1 = arith.constant 0 : i32
    return %c0_i32, %c0_i32_0 : i32, i32
  }
  func.func @transform_4(%arg0: i32, %arg1: i32, %arg2: i32) -> (i32, i32) {
    %c0_i32 = arith.constant 0 : i32
    %c0_i32_0 = arith.constant 0 : i32
    %c0_i32_1 = arith.constant 0 : i32
    return %c0_i32, %c0_i32_0 : i32, i32
  }
  func.func @transform_5(%arg0: i32, %arg1: i32, %arg2: i32) -> (i32, i32) {
    %c0_i32 = arith.constant 0 : i32
    %c0_i32_0 = arith.constant 0 : i32
    %c0_i32_1 = arith.constant 0 : i32
    return %c0_i32, %c0_i32_0 : i32, i32
  }
  func.func @transform_6(%arg0: i32, %arg1: i32, %arg2: i32) -> (i32, i32, i32) {
    %c2_i32 = arith.constant 2 : i32
    %0 = arith.muli %arg1, %c2_i32 : i32
    %1 = arith.addi %0, %arg2 : i32
    %c0_i32 = arith.constant 0 : i32
    %c0_i32_0 = arith.constant 0 : i32
    return %arg0, %1, %c0_i32 : i32, i32, i32
  }
  func.func @transform_7(%arg0: i32, %arg1: i32, %arg2: i32) -> (i32, i32, i32, i32) {
    %c0_i32 = arith.constant 0 : i32
    %c0_i32_0 = arith.constant 0 : i32
    %c0_i32_1 = arith.constant 0 : i32
    return %arg0, %arg1, %c0_i32, %c0_i32_0 : i32, i32, i32, i32
  }
}

module attributes {stable_mosaic.version = 11 : i64} {
  func.func @_pass2_kernel(%arg0: i32, %arg1: i32, %arg2: i32, %arg3: memref<1x96x128xbf16, #tpu.memory_space<vmem>>, %arg4: memref<1x96x128xbf16, #tpu.memory_space<vmem>>, %arg5: memref<1x96x37xbf16, #tpu.memory_space<vmem>>, %arg6: memref<1x2x128xf32, #tpu.memory_space<vmem>>, %arg7: memref<1x2x128xf32, #tpu.memory_space<vmem>>, %arg8: memref<37x256xbf16, #tpu.memory_space<vmem>>, %arg9: memref<37x256xbf16, #tpu.memory_space<vmem>>, %arg10: memref<128x128xbf16, #tpu.memory_space<vmem>>, %arg11: memref<128x128xbf16, #tpu.memory_space<vmem>>, %arg12: memref<1x128xf32, #tpu.memory_space<vmem>>, %arg13: memref<1x128xf32, #tpu.memory_space<vmem>>, %arg14: memref<1x96x128xbf16, #tpu.memory_space<vmem>>) attributes {dimension_semantics = [#tpu.dimension_semantics<parallel>, #tpu.dimension_semantics<parallel>, #tpu.dimension_semantics<parallel>], iteration_bounds = array<i64: 2, 2, 2>, scalar_prefetch = 0 : i64, scratch_operands = 0 : i64, tpu.core_type = #tpu.core_type<tc>, window_params = [{transform_indices = @transform_0, window_bounds = array<i64: 1, 96, 128>}, {transform_indices = @transform_1, window_bounds = array<i64: 1, 96, 128>}, {transform_indices = @transform_2, window_bounds = array<i64: 1, 96, 37>}, {transform_indices = @transform_3, window_bounds = array<i64: 1, 2, 128>}, {transform_indices = @transform_4, window_bounds = array<i64: 1, 2, 128>}, {pipeline_mode = #tpu.pipeline_mode<synchronous>, transform_indices = @transform_5, window_bounds = array<i64: 37, 256>}, {pipeline_mode = #tpu.pipeline_mode<synchronous>, transform_indices = @transform_6, window_bounds = array<i64: 37, 256>}, {pipeline_mode = #tpu.pipeline_mode<synchronous>, transform_indices = @transform_7, window_bounds = array<i64: 128, 128>}, {pipeline_mode = #tpu.pipeline_mode<synchronous>, transform_indices = @transform_8, window_bounds = array<i64: 128, 128>}, {pipeline_mode = #tpu.pipeline_mode<synchronous>, transform_indices = @transform_9, window_bounds = array<i64: 1, 128>}, {pipeline_mode = #tpu.pipeline_mode<synchronous>, transform_indices = @transform_10, window_bounds = array<i64: 1, 128>}, {transform_indices = @transform_11, window_bounds = array<i64: 1, 96, 128>}]} {
    %c0 = arith.constant 0 : index
    %c0_0 = arith.constant 0 : index
    %c0_1 = arith.constant 0 : index
    %0 = vector.load %arg5[%c0, %c0_0, %c0_1] : memref<1x96x37xbf16, #tpu.memory_space<vmem>>, vector<1x96x37xbf16>
    %1 = vector.shape_cast %0 : vector<1x96x37xbf16> to vector<96x37xbf16>
    %c0_2 = arith.constant 0 : index
    %c0_3 = arith.constant 0 : index
    %c0_4 = arith.constant 0 : index
    %2 = vector.load %arg6[%c0_2, %c0_3, %c0_4] : memref<1x2x128xf32, #tpu.memory_space<vmem>>, vector<1x2x128xf32>
    %3 = vector.shape_cast %2 : vector<1x2x128xf32> to vector<2x128xf32>
    %c0_5 = arith.constant 0 : index
    %c0_6 = arith.constant 0 : index
    %c0_7 = arith.constant 0 : index
    %4 = vector.load %arg3[%c0_5, %c0_6, %c0_7] : memref<1x96x128xbf16, #tpu.memory_space<vmem>>, vector<1x96x128xbf16>
    %5 = vector.shape_cast %4 : vector<1x96x128xbf16> to vector<96x128xbf16>
    %6 = arith.extf %5 : vector<96x128xbf16> to vector<96x128xf32>
    %7 = vector.extract_strided_slice %3 {offsets = [0, 0], sizes = [1, 128], strides = [1, 1]} : vector<2x128xf32> to vector<1x128xf32>
    %8 = vector.broadcast %7 : vector<1x128xf32> to vector<96x128xf32>
    %9 = arith.subf %6, %8 : vector<96x128xf32>
    %10 = vector.extract_strided_slice %3 {offsets = [1, 0], sizes = [1, 128], strides = [1, 1]} : vector<2x128xf32> to vector<1x128xf32>
    %11 = vector.broadcast %10 : vector<1x128xf32> to vector<96x128xf32>
    %12 = arith.mulf %9, %11 : vector<96x128xf32>
    %c0_8 = arith.constant 0 : index
    %c0_9 = arith.constant 0 : index
    %13 = vector.load %arg8[%c0_8, %c0_9] : memref<37x256xbf16, #tpu.memory_space<vmem>>, vector<37x256xbf16>
    %cst = arith.constant dense<0.000000e+00> : vector<96x256xf32>
    %14 = tpu.matmul %1, %13, %cst {dimension_numbers = #tpu.dot_dimension_numbers<[1], [0], [0], [1], [0, 0, 1, 1], [], []>} : vector<96x37xbf16>, vector<37x256xbf16>, vector<96x256xf32> -> vector<96x256xf32>
    %15 = vector.extract_strided_slice %14 {offsets = [0, 0], sizes = [96, 128], strides = [1, 1]} : vector<96x256xf32> to vector<96x128xf32>
    %16 = arith.mulf %12, %15 : vector<96x128xf32>
    %17 = vector.extract_strided_slice %14 {offsets = [0, 128], sizes = [96, 128], strides = [1, 1]} : vector<96x256xf32> to vector<96x128xf32>
    %18 = arith.addf %16, %17 : vector<96x128xf32>
    %cst_10 = arith.constant 0.000000e+00 : f32
    %19 = vector.broadcast %cst_10 : f32 to vector<96x128xf32>
    %20 = arith.maximumf %18, %19 : vector<96x128xf32>
    %21 = arith.truncf %20 : vector<96x128xf32> to vector<96x128xbf16>
    %c0_11 = arith.constant 0 : index
    %c0_12 = arith.constant 0 : index
    %22 = vector.load %arg10[%c0_11, %c0_12] : memref<128x128xbf16, #tpu.memory_space<vmem>>, vector<128x128xbf16>
    %cst_13 = arith.constant dense<0.000000e+00> : vector<96x128xf32>
    %23 = tpu.matmul %21, %22, %cst_13 {dimension_numbers = #tpu.dot_dimension_numbers<[1], [0], [0], [1], [0, 0, 1, 1], [], []>} : vector<96x128xbf16>, vector<128x128xbf16>, vector<96x128xf32> -> vector<96x128xf32>
    %c0_14 = arith.constant 0 : index
    %c0_15 = arith.constant 0 : index
    %24 = vector.load %arg12[%c0_14, %c0_15] : memref<1x128xf32, #tpu.memory_space<vmem>>, vector<1x128xf32>
    %25 = vector.broadcast %24 : vector<1x128xf32> to vector<96x128xf32>
    %26 = arith.addf %23, %25 : vector<96x128xf32>
    %c0_16 = arith.constant 0 : index
    %c0_17 = arith.constant 0 : index
    %c0_18 = arith.constant 0 : index
    %27 = vector.load %arg7[%c0_16, %c0_17, %c0_18] : memref<1x2x128xf32, #tpu.memory_space<vmem>>, vector<1x2x128xf32>
    %28 = vector.shape_cast %27 : vector<1x2x128xf32> to vector<2x128xf32>
    %c0_19 = arith.constant 0 : index
    %c0_20 = arith.constant 0 : index
    %c0_21 = arith.constant 0 : index
    %29 = vector.load %arg4[%c0_19, %c0_20, %c0_21] : memref<1x96x128xbf16, #tpu.memory_space<vmem>>, vector<1x96x128xbf16>
    %30 = vector.shape_cast %29 : vector<1x96x128xbf16> to vector<96x128xbf16>
    %31 = arith.extf %30 : vector<96x128xbf16> to vector<96x128xf32>
    %32 = vector.extract_strided_slice %28 {offsets = [0, 0], sizes = [1, 128], strides = [1, 1]} : vector<2x128xf32> to vector<1x128xf32>
    %33 = vector.broadcast %32 : vector<1x128xf32> to vector<96x128xf32>
    %34 = arith.subf %31, %33 : vector<96x128xf32>
    %35 = vector.extract_strided_slice %28 {offsets = [1, 0], sizes = [1, 128], strides = [1, 1]} : vector<2x128xf32> to vector<1x128xf32>
    %36 = vector.broadcast %35 : vector<1x128xf32> to vector<96x128xf32>
    %37 = arith.mulf %34, %36 : vector<96x128xf32>
    %c0_22 = arith.constant 0 : index
    %c0_23 = arith.constant 0 : index
    %38 = vector.load %arg9[%c0_22, %c0_23] : memref<37x256xbf16, #tpu.memory_space<vmem>>, vector<37x256xbf16>
    %cst_24 = arith.constant dense<0.000000e+00> : vector<96x256xf32>
    %39 = tpu.matmul %1, %38, %cst_24 {dimension_numbers = #tpu.dot_dimension_numbers<[1], [0], [0], [1], [0, 0, 1, 1], [], []>} : vector<96x37xbf16>, vector<37x256xbf16>, vector<96x256xf32> -> vector<96x256xf32>
    %40 = vector.extract_strided_slice %39 {offsets = [0, 0], sizes = [96, 128], strides = [1, 1]} : vector<96x256xf32> to vector<96x128xf32>
    %41 = arith.mulf %37, %40 : vector<96x128xf32>
    %42 = vector.extract_strided_slice %39 {offsets = [0, 128], sizes = [96, 128], strides = [1, 1]} : vector<96x256xf32> to vector<96x128xf32>
    %43 = arith.addf %41, %42 : vector<96x128xf32>
    %cst_25 = arith.constant 0.000000e+00 : f32
    %44 = vector.broadcast %cst_25 : f32 to vector<96x128xf32>
    %45 = arith.maximumf %43, %44 : vector<96x128xf32>
    %46 = arith.truncf %45 : vector<96x128xf32> to vector<96x128xbf16>
    %c0_26 = arith.constant 0 : index
    %c0_27 = arith.constant 0 : index
    %47 = vector.load %arg11[%c0_26, %c0_27] : memref<128x128xbf16, #tpu.memory_space<vmem>>, vector<128x128xbf16>
    %cst_28 = arith.constant dense<0.000000e+00> : vector<96x128xf32>
    %48 = tpu.matmul %46, %47, %cst_28 {dimension_numbers = #tpu.dot_dimension_numbers<[1], [0], [0], [1], [0, 0, 1, 1], [], []>} : vector<96x128xbf16>, vector<128x128xbf16>, vector<96x128xf32> -> vector<96x128xf32>
    %49 = arith.addf %26, %48 : vector<96x128xf32>
    %c0_29 = arith.constant 0 : index
    %c0_30 = arith.constant 0 : index
    %50 = vector.load %arg13[%c0_29, %c0_30] : memref<1x128xf32, #tpu.memory_space<vmem>>, vector<1x128xf32>
    %51 = vector.broadcast %50 : vector<1x128xf32> to vector<96x128xf32>
    %52 = arith.addf %49, %51 : vector<96x128xf32>
    %53 = arith.truncf %52 : vector<96x128xf32> to vector<96x128xbf16>
    %c0_31 = arith.constant 0 : index
    %c0_32 = arith.constant 0 : index
    %c0_33 = arith.constant 0 : index
    %54 = vector.load %arg14[%c0_31, %c0_32, %c0_33] : memref<1x96x128xbf16, #tpu.memory_space<vmem>>, vector<1x96x128xbf16>
    %55 = vector.shape_cast %54 : vector<1x96x128xbf16> to vector<96x128xbf16>
    %56 = vector.shape_cast %53 : vector<96x128xbf16> to vector<1x96x128xbf16>
    tpu.vector_store %arg14[%c0_31, %c0_32, %c0_33], %56 {strides = array<i32>} : memref<1x96x128xbf16, #tpu.memory_space<vmem>>, vector<1x96x128xbf16>,
    return
  }
  func.func @transform_0(%arg0: i32, %arg1: i32, %arg2: i32) -> (i32, i32, i32) {
    %c2_i32 = arith.constant 2 : i32
    %0 = arith.muli %arg1, %c2_i32 : i32
    %1 = arith.addi %0, %arg2 : i32
    %c0_i32 = arith.constant 0 : i32
    %c0_i32_0 = arith.constant 0 : i32
    return %arg0, %1, %c0_i32 : i32, i32, i32
  }
  func.func @transform_1(%arg0: i32, %arg1: i32, %arg2: i32) -> (i32, i32, i32) {
    %c2_i32 = arith.constant 2 : i32
    %0 = arith.muli %arg1, %c2_i32 : i32
    %1 = arith.addi %0, %arg2 : i32
    %c0_i32 = arith.constant 0 : i32
    %c0_i32_0 = arith.constant 0 : i32
    return %arg0, %1, %c0_i32 : i32, i32, i32
  }
  func.func @transform_2(%arg0: i32, %arg1: i32, %arg2: i32) -> (i32, i32, i32) {
    %c2_i32 = arith.constant 2 : i32
    %0 = arith.muli %arg1, %c2_i32 : i32
    %1 = arith.addi %0, %arg2 : i32
    %c0_i32 = arith.constant 0 : i32
    %c0_i32_0 = arith.constant 0 : i32
    return %arg0, %1, %c0_i32 : i32, i32, i32
  }
  func.func @transform_3(%arg0: i32, %arg1: i32, %arg2: i32) -> (i32, i32, i32) {
    %c0_i32 = arith.constant 0 : i32
    %c0_i32_0 = arith.constant 0 : i32
    %c0_i32_1 = arith.constant 0 : i32
    return %arg0, %c0_i32, %c0_i32_0 : i32, i32, i32
  }
  func.func @transform_4(%arg0: i32, %arg1: i32, %arg2: i32) -> (i32, i32, i32) {
    %c0_i32 = arith.constant 0 : i32
    %c0_i32_0 = arith.constant 0 : i32
    %c0_i32_1 = arith.constant 0 : i32
    return %arg0, %c0_i32, %c0_i32_0 : i32, i32, i32
  }
  func.func @transform_5(%arg0: i32, %arg1: i32, %arg2: i32) -> (i32, i32) {
    %c0_i32 = arith.constant 0 : i32
    %c0_i32_0 = arith.constant 0 : i32
    %c0_i32_1 = arith.constant 0 : i32
    return %c0_i32, %c0_i32_0 : i32, i32
  }
  func.func @transform_6(%arg0: i32, %arg1: i32, %arg2: i32) -> (i32, i32) {
    %c0_i32 = arith.constant 0 : i32
    %c0_i32_0 = arith.constant 0 : i32
    %c0_i32_1 = arith.constant 0 : i32
    return %c0_i32, %c0_i32_0 : i32, i32
  }
  func.func @transform_7(%arg0: i32, %arg1: i32, %arg2: i32) -> (i32, i32) {
    %c0_i32 = arith.constant 0 : i32
    %c0_i32_0 = arith.constant 0 : i32
    %c0_i32_1 = arith.constant 0 : i32
    return %c0_i32, %c0_i32_0 : i32, i32
  }
  func.func @transform_8(%arg0: i32, %arg1: i32, %arg2: i32) -> (i32, i32) {
    %c0_i32 = arith.constant 0 : i32
    %c0_i32_0 = arith.constant 0 : i32
    %c0_i32_1 = arith.constant 0 : i32
    return %c0_i32, %c0_i32_0 : i32, i32
  }
  func.func @transform_9(%arg0: i32, %arg1: i32, %arg2: i32) -> (i32, i32) {
    %c0_i32 = arith.constant 0 : i32
    %c0_i32_0 = arith.constant 0 : i32
    %c0_i32_1 = arith.constant 0 : i32
    return %c0_i32, %c0_i32_0 : i32, i32
  }
  func.func @transform_10(%arg0: i32, %arg1: i32, %arg2: i32) -> (i32, i32) {
    %c0_i32 = arith.constant 0 : i32
    %c0_i32_0 = arith.constant 0 : i32
    %c0_i32_1 = arith.constant 0 : i32
    return %c0_i32, %c0_i32_0 : i32, i32
  }
  func.func @transform_11(%arg0: i32, %arg1: i32, %arg2: i32) -> (i32, i32, i32) {
    %c2_i32 = arith.constant 2 : i32
    %0 = arith.muli %arg1, %c2_i32 : i32
    %1 = arith.addi %0, %arg2 : i32
    %c0_i32 = arith.constant 0 : i32
    %c0_i32_0 = arith.constant 0 : i32
    return %arg0, %1, %c0_i32 : i32, i32, i32
  }
}

</mosaic_0001>

<bundles_post_ra>
// kernel: resblk_spade.2
= control target key start
LH: loop header
LB: loop body
LE: loop exit
PB: predicated region body
PF: predicated region fallthrough
CT: control target
= control target key end

     0   :  { %s1636_s24 = smov 0   ;;  %s1638_s25 = smov 0   ;;  %s1903_s0 = inlined_call_operand.vmem [shape: bf16[2,384,128], index: 0, kind: input, shape index: {}]   ;;  %s1904_s1 = inlined_call_operand.vmem [shape: bf16[2,384,37], index: 1, kind: input, shape index: {}]   ;;  %s1905_s2 = inlined_call_operand.vmem [shape: f32[2,2,128], index: 2, kind: input, shape index: {}]   ;;  %s1906_s3 = inlined_call_operand.vmem [shape: bf16[37,256], index: 3, kind: input, shape index: {}]   ;;  %s1907_s4 = inlined_call_operand.vmem [shape: bf16[128,128], index: 4, kind: input, shape index: {}]   ;;  %s1908_s5 = inlined_call_operand.vmem [shape: f32[1,128], index: 5, kind: input, shape index: {}]   ;;  %s1909_s6 = inlined_call_operand.vmem [shape: bf16[2,384,128], index: 6, kind: output, shape index: {0}]   ;;  %s1910_s7 = inlined_call_operand.vmem [shape: f32[2,2,2,128], index: 7, kind: output, shape index: {1}]  }
   0x1   :  { %s1640_s26 = smov 0   ;;  %s1642_s27 = smov 0  }
   0x2   :  { %s1644_s28 = smov 0   ;;  %s1646_s29 = smov 0  }
   0x3   :  { %s1648_s30 = smov 0  }
   0x4 LB: > { %s30_s8 = sadd.s32 1, %s1579_s27  ;;  %s33_s9 = sadd.s32 1, %s1583_s28  ;;  %s1591_s30 = sphi %s1648_s30, %s18_s30   ;;  %s1587_s29 = sphi %s1646_s29, %s1916_s29   ;;  %s1583_s28 = sphi %s1644_s28, %s1915_s28   ;;  %s1579_s27 = sphi %s1642_s27, %s1914_s27   ;;  %s1575_s26 = sphi %s1640_s26, %s1913_s26   ;;  %s1571_s25 = sphi %s1638_s25, %s1912_s25   ;;  %s1567_s24 = sphi %s1636_s24, %s1911_s24  }
   0x5   : > { %p31_p0 = scmp.ge.s32.totalorder %s30_s8, 2  ;;  %p1271_p1 = scmp.ge.s32.totalorder %s1591_s30, 1 }
   0x6   : > { %p316_p2 = scmp.lt.s32.totalorder %s1591_s30, 9  ;;  %s37_s10 = sadd.s32 1, %s1587_s29 }
   0x7   : > { %s1918_s8 = smov (%p31_p0, %s30_s8), 0  ;;  %s1920_s9 = smov (!%p31_p0, %s33_s9), %s1583_s28 }
   0x8   : > { %p317_p3 = pnand %p1271_p1, %p316_p2  ;;  %p35_p4 = scmp.ge.s32.totalorder %s1920_s9, 2 }
   0x9   : > { %s1272_s15 = sshll.u32 (!%p317_p3), %s1571_s25, 1  ;;  %p386_p6 = scmp.lt.s32.totalorder (!%p317_p3), %s1575_s26, 1 }
   0xa   : > { %s1922_s9 = smov (%p35_p4, %s1920_s9), 0  ;;  %s1924_s10 = smov (!%p35_p4, %s37_s10), %s1587_s29 }
   0xb   : > { %p39_p5 = scmp.ge.s32.totalorder %s1924_s10, 2  ;;  %320 = sbr.rel (%p317_p3) target bundleno = 513 (0x201), region = 44 }
   0xc   : > { %s1696_s18 = sadd.s32 (!%p317_p3), %s1567_s24, %s1272_s15  ;;  %p431_p8 = scmp.lt.s32.totalorder (!%p317_p3), %s1571_s25, 1 }
   0xd   : > { %s1926_s10 = smov (%p39_p5, %s1924_s10), 0  ;;  %s385_s23 = smul.u32 (!%p317_p3), 12, %s1696_s18 }
   0xe   : > { %p1333_p9 = scmp.ne.s32.totalorder (!%p317_p3), %s1567_s24, 0 }
   0xf   : > { %p388_p7 = scmp.lt.s32.totalorder (!%p317_p3), %s385_s23, 47 }
  0x10   : > { %v511_v0 = vld [vmem:[%s1906_s3 + $0x20] sm:$0x77]  ;;  %vm586_vm0 = vcmask 1041408   ;;  %vm587_vm1 = vcmask 1042432   ;;  %v1593_v2 = vmov 65535   ;;  %v1594_v9 = vmov 0  }
  0x11   : > { %v1292_v1 = vcombine.high %v511_v0, %v511_v0  ;;  %v588_v3 = vsel %vm586_vm0, 4294967295, %v1593_v2  ;;  %v1291_v4 = vcombine.low %v511_v0, %v511_v0  ;;  %v1517_v8 = vld [vmem:[%s1906_s3 + $0x14] ss:$8 sps:$4 sm:$0xff]   ;;  %628 = vmatprep.mubr.bf16.mxu0 %v1594_v9  ;;  %v1519_v10 = vld [vmem:[%s1906_s3 + $0x10] ss:$8 sps:$4 sm:$0xff]   ;;  %s1928_s26 = smov (!%p386_p6, %s1575_s26), 1  ;;  %v463_v27 = vlaneseq }
  0x12   : > { %v589_v5 = vsel %vm587_vm1, %v588_v3, 0  ;;  %v1529_v11 = vld [vmem:[%s1907_s4 + $0x38] sm:$0xff]   ;;  %v1520_v12 = vld [vmem:[%s1906_s3 + $0x4] ss:$8 sps:$4 sm:$0xff]   ;;  %v1530_v13 = vld [vmem:[%s1907_s4 + $0x30] sm:$0xff]   ;;  %s1455_s15 = smul.u32 48, %s1928_s26 }
  0x13   : > { %v594_v6 = vand.u32 %v1292_v1, %v589_v5  ;;  %v591_v7 = vand.u32 %v1291_v4, %v589_v5  ;;  %1427 = vmatprep.subr.bf16.mxu1 %v1529_v11  ;;  %v1522_v14 = vld [vmem:[%s1906_s3] ss:$8 sps:$4 sm:$0xff]   ;;  %s1930_s23 = smov (!%p388_p7, %s385_s23), 47  ;;  %vm567_vm2 = vcmask 302080   ;;  %s1932_s25 = smov (!%p431_p8, %s1571_s25), 1  ;;  %v1533_v23 = vld [vmem:[%s1907_s4 + $0x18] sm:$0xff]  }
  0x14   : > { %1428 = vmatpush3.bf16.msra.mxu1 %v1529_v11  ;;  %v1531_v15 = vld [vmem:[%s1907_s4 + $0x28] sm:$0xff]   ;;  %s391_s19 = sadd.s32 %s1455_s15, %s1930_s23  ;;  %s1276_s12 = sshll.u32 %s1928_s26, 1  ;;  %v1532_v22 = vld [vmem:[%s1907_s4 + $0x20] sm:$0xff]   ;;  %v1534_v24 = vld [vmem:[%s1907_s4 + $0x10] sm:$0xff]   ;;  %v1757_v28 = vshrl.u32 %v463_v27, 7 }
  0x15   : > { %606 = vmatprep.subr.bf16.mxu0 %v594_v6  ;;  %1429 = vmatprep.subr.bf16.mxu1 %v1530_v13  ;;  %s1719_s20 = sshll.u32 %s391_s19, 2  ;;  %s434_s13 = sadd.s32 %s1276_s12, %s1932_s25  ;;  %v1535_v25 = vld [vmem:[%s1907_s4 + $0x8] sm:$0xff]   ;;  %v1536_v26 = vld [vmem:[%s1907_s4] sm:$0xff]  }
  0x16   : > { %607 = vmatpush1.bf16.msra.mxu0 %v591_v7  ;;  %s407_s11 = scalar_lea.vmem %s1904_s1, %s1719_s20  ;;  %s1280_s14 = sshll.u32 %s434_s13, 1  ;;  %v465_v29 = vsub.s32 0, %v1757_v28  ;;  %v481_v33 = vsub.s32 1, %v1757_v28 }
  0x17   : > { %608 = vmatprep.subr.bf16.mxu0 %v1517_v8  ;;  %v1523_v16 = vld [vmem:[%s407_s11] sm:$0xff]   ;;  %s1735_s16 = scalar_lea.vmem %s1910_s7, %s1280_s14  ;;  %v1524_v17 = vld [vmem:[%s407_s11 + $0x8] sm:$0xff]   ;;  %v1525_v18 = vld [vmem:[%s407_s11 + $0x10] sm:$0xff]   ;;  %s414_s19 = scalar_lea.vmem %s1905_s2, %s1276_s12 }
  0x18   : > { %1430 = vmatpush3.bf16.msra.mxu1 %v1530_v13  ;;  %v1526_v19 = vld [vmem:[%s407_s11 + $0x18] sm:$0xff]   ;;  %v1527_v20 = vld [vmem:[%s407_s11 + $0x20] sm:$0xff]   ;;  %v1528_v21 = vld [vmem:[%s407_s11 + $0x28] sm:$0xff]   ;;  %s1768_s13 = scalar_lea.vmem %s1903_s0, %s1719_s20  ;;  %s945_s26 = smul.u32 96, %s1696_s18 }
  0x19   : > { %1431 = vmatprep.subr.bf16.mxu1 %v1531_v15  ;;  %v438_v30 = vld [vmem:[%s414_s19] sm:$0x3]  ;;  %v1403_v38 = vld [vmem:[%s1768_s13 + $0x8] sm:$0xff]   ;;  %v1404_v48 = vld [vmem:[%s1768_s13 + $0x10] sm:$0xff]   ;;  %s1825_s23 = scalar_lea.vmem %s1909_s6, %s1719_s20 }
  0x1a   : > { %609 = vmatpush1.bf16.msra.mxu0 %v1519_v10  ;;  %v1350_v31 = vld [vmem:[%s1768_s13] sm:$0xff]   ;;  %v1772_v32 = vrot.slane %v438_v30, %v465_v29  ;;  %v1775_v35 = vrot.slane %v438_v30, %v481_v33  ;;  %v1355_v41 = vunpack.c.l.bf16 %v1403_v38  ;;  %v1356_v43 = vunpack.c.h.bf16 %v1403_v38  ;;  %v1405_v1 = vld [vmem:[%s1768_s13 + $0x18] sm:$0xff]  }
  0x1b   : > { %610 = vmatprep.subr.bf16.mxu0 %v1520_v12  ;;  %v1351_v34 = vunpack.c.l.bf16 %v1350_v31  ;;  %v1352_v37 = vunpack.c.h.bf16 %v1350_v31  ;;  %v1359_v54 = vunpack.c.l.bf16 %v1404_v48  ;;  %v1360_v59 = vunpack.c.h.bf16 %v1404_v48 }
  0x1c   : > { %1432 = vmatpush3.bf16.msra.mxu1 %v1531_v15  ;;  %v469_v46 = vsub.f32 %v1355_v41, %v1772_v32  ;;  %v470_v50 = vsub.f32 %v1356_v43, %v1772_v32  ;;  %v1363_v8 = vunpack.c.l.bf16 %v1405_v1  ;;  %v1364_v13 = vunpack.c.h.bf16 %v1405_v1 }
  0x1d   : > { %1433 = vmatprep.subr.bf16.mxu1 %v1532_v22  ;;  %v467_v36 = vsub.f32 %v1351_v34, %v1772_v32  ;;  %v468_v40 = vsub.f32 %v1352_v37, %v1772_v32  ;;  %v471_v63 = vsub.f32 %v1359_v54, %v1772_v32  ;;  %v472_v4 = vsub.f32 %v1360_v59, %v1772_v32 }
  0x1e   : > { %611 = vmatpush1.bf16.msra.mxu0 %v1522_v14  ;;  %v485_v53 = vmul.f32 %v1775_v35, %v469_v46  ;;  %v486_v58 = vmul.f32 %v1775_v35, %v470_v50 }
  0x1f   : > { %v483_v39 = vmul.f32 %v1775_v35, %v467_v36  ;;  %v484_v45 = vmul.f32 %v1775_v35, %v468_v40  ;;  %v487_v7 = vmul.f32 %v1775_v35, %v471_v63  ;;  %v488_v12 = vmul.f32 %v1775_v35, %v472_v4 }
  0x20   : > { %1434 = vmatpush3.bf16.msra.mxu1 %v1532_v22  ;;  %v474_v22 = vsub.f32 %v1364_v13, %v1772_v32 }
  0x21   : > { %1293 = vmatmul.mubr.msk.bf16.vlgmr.msra.gmra.mxu0 %vm567_vm2, %v1523_v16  ;;  %1435 = vmatprep.subr.bf16.mxu1 %v1533_v23 }
  0x22   : > { %638 = vmatprep.mubr.bf16.mxu0 %v1594_v9  ;;  %v490_v31 = vmul.f32 %v1775_v35, %v474_v22 }
  0x24   : > { %1436 = vmatpush3.bf16.msra.mxu1 %v1533_v23 }
  0x25   : > { %1437 = vmatprep.subr.bf16.mxu1 %v1534_v24 }
  0x28   : > { %1438 = vmatpush3.bf16.msra.mxu1 %v1534_v24 }
  0x29   : > { %1294 = vmatmul.mubr.msk.bf16.gmra.mxu0 %vm567_vm2, %v1524_v17  ;;  %1439 = vmatprep.subr.bf16.mxu1 %v1535_v25  ;;  %v473_v17 = vsub.f32 %v1363_v8, %v1772_v32 }
  0x2a   : > { %648 = vmatprep.mubr.bf16.mxu0 %v1594_v9 }
  0x2c   : > { %1440 = vmatpush3.bf16.msra.mxu1 %v1535_v25  ;;  %v489_v25 = vmul.f32 %v1775_v35, %v473_v17 }
  0x2d   : > { %1441 = vmatprep.subr.bf16.mxu1 %v1536_v26 }
  0x30   : > { %1442 = vmatpush3.bf16.msra.mxu1 %v1536_v26 }
  0x31   : > { %1295 = vmatmul.mubr.msk.bf16.gmra.mxu0 %vm567_vm2, %v1525_v18 }
  0x32   : > { %658 = vmatprep.mubr.bf16.mxu0 %v1594_v9 }
  0x39   : > { %1296 = vmatmul.mubr.msk.bf16.gmra.mxu0 %vm567_vm2, %v1526_v19  ;;  %v1406_v19 = vld [vmem:[%s1768_s13 + $0x20] sm:$0xff]  }
  0x3a   : > { %668 = vmatprep.mubr.bf16.mxu0 %v1594_v9  ;;  %v1367_v26 = vunpack.c.l.bf16 %v1406_v19  ;;  %v1368_v33 = vunpack.c.h.bf16 %v1406_v19 }
  0x3c   : > { %v475_v38 = vsub.f32 %v1367_v26, %v1772_v32  ;;  %v476_v43 = vsub.f32 %v1368_v33, %v1772_v32  ;;  %v950_v33 = vadd.s32 24, %v1757_v28 }
  0x41   : > { %1297 = vmatmul.mubr.msk.bf16.gmra.mxu0 %vm567_vm2, %v1527_v20 }
  0x42   : > { %678 = vmatprep.mubr.bf16.mxu0 %v1594_v9 }
  0x49   : > { %1298 = vmatmul.mubr.msk.bf16.gmra.mxu0 %vm567_vm2, %v1528_v21 }
  0xe1   : > { %v630_v42 = vpop.f32.mrf.mxu0 }
  0xe2   : > { %v689_v44 = vmul.f32 %v630_v42, %v483_v39  ;;  %v1407_v39 = vld [vmem:[%s1768_s13 + $0x28] sm:$0xff]  }
  0xe3   : > { %v632_v47 = vpop.f32.mrf.mxu0 }
  0xe4   : > { %v701_v51 = vadd.f32 %v689_v44, %v632_v47  ;;  %v1371_v44 = vunpack.c.l.bf16 %v1407_v39  ;;  %v491_v47 = vmul.f32 %v1775_v35, %v475_v38 }
  0xe5   : > { %v634_v49 = vpop.f32.mrf.mxu0 }
  0xe6   : > { %v690_v52 = vmul.f32 %v634_v49, %v484_v45  ;;  %v713_v60 = vmax.f32 %v701_v51, 0.0  ;;  %v492_v51 = vmul.f32 %v1775_v35, %v476_v43 }
  0xe7   : > { %v636_v55 = vpop.f32.mrf.mxu0 }
  0xe8   : > { %v702_v56 = vadd.f32 %v690_v52, %v636_v55  ;;  %v477_v52 = vsub.f32 %v1371_v44, %v1772_v32 }
  0xe9   : > { %v640_v57 = vpop.f32.mrf.mxu0 }
  0xea   : > { %v714_v61 = vmax.f32 %v702_v56, 0.0  ;;  %v691_v62 = vmul.f32 %v640_v57, %v485_v53  ;;  %v1372_v56 = vunpack.c.h.bf16 %v1407_v39  ;;  %v952_v39 = vadd.s32 40, %v1757_v28 }
  0xeb   : > { %v642_v0 = vpop.f32.mrf.mxu0 }
  0xec   : > { %v725_v2 = vpack.c.bf16 %v714_v61, %v713_v60  ;;  %v703_v5 = vadd.f32 %v691_v62, %v642_v0  ;;  %v493_v62 = vmul.f32 %v1775_v35, %v477_v52  ;;  %v478_v63 = vsub.f32 %v1372_v56, %v1772_v32 }
  0xed   : > { %v644_v3 = vpop.f32.mrf.mxu0 }
  0xee   : > { %v692_v6 = vmul.f32 %v644_v3, %v486_v58  ;;  %1443 = vmatprep.mubr.bf16.mxu1 %v725_v2  ;;  %v715_v14 = vmax.f32 %v703_v5, 0.0 }
  0xef   : > { %v646_v9 = vpop.f32.mrf.mxu0 }
  0xf0   : > { %v704_v10 = vadd.f32 %v692_v6, %v646_v9  ;;  %v494_v6 = vmul.f32 %v1775_v35, %v478_v63  ;;  %v1811_v35 = vld [vmem:[%s1908_s5] ss:$0 sm:$0xff] }
  0xf1   : > { %v650_v11 = vpop.f32.mrf.mxu0 }
  0xf2   : > { %v716_v15 = vmax.f32 %v704_v10, 0.0  ;;  %v693_v16 = vmul.f32 %v650_v11, %v487_v7 }
  0xf3   : > { %v652_v18 = vpop.f32.mrf.mxu0 }
  0xf4   : > { %v726_v20 = vpack.c.bf16 %v716_v15, %v715_v14  ;;  %v705_v23 = vadd.f32 %v693_v16, %v652_v18  ;;  %v948_v16 = vadd.s32 8, %v1757_v28  ;;  %v1813_v18 = vstv %s945_s26 }
  0xf5   : > { %v654_v21 = vpop.f32.mrf.mxu0 }
  0xf6   : > { %v694_v24 = vmul.f32 %v654_v21, %v488_v12  ;;  %1444 = vmatmul.mubr.bf16.vlgmr.msra.gmra.mxu1 %v726_v20  ;;  %v717_v34 = vmax.f32 %v705_v23, 0.0  ;;  %v961_v20 = vadd.s32 %v1813_v18, %v948_v16  ;;  %v949_v21 = vadd.s32 16, %v1757_v28 }
  0xf7   : > { %v656_v27 = vpop.f32.mrf.mxu0  ;;  %v957_v16 = vadd.s32 80, %v1757_v28 }
  0xf8   : > { %v706_v29 = vadd.f32 %v694_v24, %v656_v27  ;;  %v960_v24 = vadd.s32 %v1813_v18, %v1757_v28  ;;  %vm973_vm3 = vcmp.lt.s32.totalorder %v961_v20, 256 }
  0xf9   : > { %v660_v30 = vpop.f32.mrf.mxu0 }
  0xfa   : > { %v718_v36 = vmax.f32 %v706_v29, 0.0  ;;  %v695_v37 = vmul.f32 %v660_v30, %v489_v25  ;;  %vm972_vm4 = vcmp.lt.s32.totalorder %v960_v24, 256 }
  0xfb   : > { %v662_v40 = vpop.f32.mrf.mxu0 }
  0xfc   : > { %v727_v41 = vpack.c.bf16 %v718_v36, %v717_v34  ;;  %v707_v45 = vadd.f32 %v695_v37, %v662_v40  ;;  %v951_v36 = vadd.s32 32, %v1757_v28  ;;  %v1595_v37 = vmov 0.0  }
  0xfd   : > { %v664_v42 = vpop.f32.mrf.mxu0  ;;  %v1322_v38 = vsel %vm973_vm3, 1.0, %v1595_v37  ;;  %v1321_v40 = vsel %vm972_vm4, 1.0, %v1595_v37 }
  0xfe   : > { %v696_v46 = vmul.f32 %v664_v42, %v490_v31  ;;  %1447 = vmatprep.mubr.bf16.mxu1 %v727_v41  ;;  %v719_v53 = vmax.f32 %v707_v45, 0.0  ;;  %v962_v31 = vadd.s32 %v1813_v18, %v949_v21  ;;  %v963_v41 = vadd.s32 %v1813_v18, %v950_v33 }
  0xff   : > { %v666_v48 = vpop.f32.mrf.mxu0  ;;  %v964_v43 = vadd.s32 %v1813_v18, %v951_v36  ;;  %v965_v45 = vadd.s32 %v1813_v18, %v952_v39 }
 0x100   : > { %v708_v49 = vadd.f32 %v696_v46, %v666_v48  ;;  %vm974_vm5 = vcmp.lt.s32.totalorder %v962_v31, 256  ;;  %v953_v48 = vadd.s32 48, %v1757_v28  ;;  %vm975_vm6 = vcmp.lt.s32.totalorder %v963_v41, 256 }
 0x101   : > { %v670_v50 = vpop.f32.mrf.mxu0  ;;  %v1323_v46 = vsel %vm974_vm5, 1.0, %v1595_v37  ;;  %vm976_vm7 = vcmp.lt.s32.totalorder %v964_v43, 256  ;;  %vm977_vm8 = vcmp.lt.s32.totalorder %v965_v45, 256 }
 0x102   : > { %v720_v54 = vmax.f32 %v708_v49, 0.0  ;;  %v697_v55 = vmul.f32 %v670_v50, %v491_v47  ;;  %v966_v56 = vadd.s32 %v1813_v18, %v953_v48 }
 0x103   : > { %v672_v57 = vpop.f32.mrf.mxu0 }
 0x104   : > { %v728_v58 = vpack.c.bf16 %v720_v54, %v719_v53  ;;  %v709_v60 = vadd.f32 %v697_v55, %v672_v57  ;;  %v1324_v54 = vsel %vm975_vm6, 1.0, %v1595_v37  ;;  %v1325_v57 = vsel %vm976_vm7, 1.0, %v1595_v37 }
 0x105   : > { %v674_v59 = vpop.f32.mrf.mxu0  ;;  %vm978_vm9 = vcmp.lt.s32.totalorder %v966_v56, 256 }
 0x106   : > { %v698_v61 = vmul.f32 %v674_v59, %v492_v51  ;;  %1448 = vmatmul.mubr.bf16.gmra.mxu1 %v728_v58  ;;  %v721_v3 = vmax.f32 %v709_v60, 0.0 }
 0x107   : > { %v676_v0 = vpop.f32.mrf.mxu0 }
 0x108   : > { %v710_v1 = vadd.f32 %v698_v61, %v676_v0  ;;  %v1326_v0 = vsel %vm977_vm8, 1.0, %v1595_v37 }
 0x109   : > { %v680_v2 = vpop.f32.mrf.mxu0 }
 0x10a   : > { %v722_v4 = vmax.f32 %v710_v1, 0.0  ;;  %v699_v5 = vmul.f32 %v680_v2, %v493_v62  ;;  %v954_v62 = vadd.s32 56, %v1757_v28  ;;  %v955_v1 = vadd.s32 64, %v1757_v28 }
 0x10b   : > { %v682_v7 = vpop.f32.mrf.mxu0 }
 0x10c   : > { %v729_v8 = vpack.c.bf16 %v722_v4, %v721_v3  ;;  %v711_v10 = vadd.f32 %v699_v5, %v682_v7 }
 0x10d   : > { %v684_v9 = vpop.f32.mrf.mxu0 }
 0x10e   : > { %v700_v11 = vmul.f32 %v684_v9, %v494_v6  ;;  %1451 = vmatprep.mubr.bf16.mxu1 %v729_v8  ;;  %v723_v14 = vmax.f32 %v711_v10, 0.0  ;;  %v967_v9 = vadd.s32 %v1813_v18, %v954_v62 }
 0x10f   : > { %v686_v12 = vpop.f32.mrf.mxu0 }
 0x110   : > { %v712_v13 = vadd.f32 %v700_v11, %v686_v12  ;;  %vm979_vm10 = vcmp.lt.s32.totalorder %v967_v9, 256 }
 0x112   : > { %v724_v32 = vmax.f32 %v712_v13, 0.0 }
 0x114   : > { %v730_v15 = vpack.c.bf16 %v724_v32, %v723_v14  ;;  %v968_v14 = vadd.s32 %v1813_v18, %v955_v1  ;;  %v1327_v32 = vsel %vm978_vm9, 1.0, %v1595_v37 }
 0x116   : > { %1452 = vmatmul.mubr.bf16.gmra.mxu1 %v730_v15  ;;  %vm980_vm11 = vcmp.lt.s32.totalorder %v968_v14, 256 }
 0x1b6   : > { %v1445_v17 = vpop.f32.mrf.mxu1 }
 0x1b7   : > { %v845_v23 = vadd.f32 %v1445_v17, %v1811_v35  ;;  %v956_v17 = vadd.s32 72, %v1757_v28 }
 0x1b8   : > { %v836_v19 = vpop.f32.mrf.mxu1 }
 0x1b9   : > { %v837_v27 = vadd.f32 %v1811_v35, %v836_v19  ;;  %v1010_v51 = vmul.f32 %v1323_v46, %v845_v23 }
 0x1ba   : > { %v1446_v22 = vpop.f32.mrf.mxu1 }
 0x1bb   : > { %v848_v25 = vadd.f32 %v1446_v22, %v1811_v35  ;;  %v1008_v44 = vmul.f32 %v1321_v40, %v837_v27  ;;  %v1039_v2 = vmul.f32 %v1010_v51, %v845_v23  ;;  %v958_v22 = vadd.s32 88, %v1757_v28 }
 0x1bc   : > { %v839_v26 = vpop.f32.mrf.mxu1 }
 0x1bd   : > { %v1381_v29 = vpack.c.bf16 %v848_v25, %v845_v23  ;;  %v840_v30 = vadd.f32 %v1811_v35, %v839_v26  ;;  %v1037_v52 = vmul.f32 %v1008_v44, %v837_v27  ;;  %v1011_v3 = vmul.f32 %v1324_v54, %v848_v25 }
 0x1be   : > { %v971_v36 = vadd.s32 %v1813_v18, %v958_v22 }
 0x1bf   : > { %1408 = vst [vmem:[%s1825_s23 + $0x8] sm:$0xff] %v1381_v29   ;;  %v1376_v34 = vpack.c.bf16 %v840_v30, %v837_v27  ;;  %v1009_v42 = vmul.f32 %v1322_v38, %v840_v30  ;;  %v1040_v12 = vmul.f32 %v1011_v3, %v848_v25  ;;  %v1328_v25 = vsel %vm979_vm10, 1.0, %v1595_v37 }
 0x1c0   : > { %v970_v29 = vadd.s32 %v1813_v18, %v957_v16  ;;  %vm983_vm14 = vcmp.lt.s32.totalorder %v971_v36, 256 }
 0x1c1   : > { %1377 = vst [vmem:[%s1825_s23] sm:$0xff] %v1376_v34   ;;  %v1038_v49 = vmul.f32 %v1009_v42, %v840_v30  ;;  %v1020_v55 = vadd.f32 %v1009_v42, %v1008_v44  ;;  %v969_v30 = vadd.s32 %v1813_v18, %v956_v17  ;;  %v1329_v34 = vsel %vm980_vm11, 1.0, %v1595_v37 }
 0x1c2   : > { %vm982_vm12 = vcmp.lt.s32.totalorder %v970_v29, 256  ;;  %v1332_v54 = vsel %vm983_vm14, 1.0, %v1595_v37 }
 0x1c3   : > { %v1049_v59 = vadd.f32 %v1038_v49, %v1037_v52  ;;  %v1021_v6 = vadd.f32 %v1020_v55, %v1010_v51  ;;  %vm981_vm13 = vcmp.lt.s32.totalorder %v969_v30, 256  ;;  %v1331_v18 = vsel %vm982_vm12, 1.0, %v1595_v37 }
 0x1c4   : > { %v1330_v49 = vsel %vm981_vm13, 1.0, %v1595_v37 }
 0x1c5   : > { %v1050_v8 = vadd.f32 %v1049_v59, %v1039_v2  ;;  %v1022_v15 = vadd.f32 %v1021_v6, %v1011_v3 }
 0x1c6   : > { %v1449_v47 = vpop.f32.mrf.mxu1 }
 0x1c7   : > { %v861_v60 = vadd.f32 %v1449_v47, %v1811_v35  ;;  %v1051_v19 = vadd.f32 %v1050_v8, %v1040_v12 }
 0x1c8   : > { %v852_v50 = vpop.f32.mrf.mxu1 }
 0x1c9   : > { %v853_v53 = vadd.f32 %v1811_v35, %v852_v50  ;;  %v1014_v23 = vmul.f32 %v1327_v32, %v861_v60 }
 0x1ca   : > { %v1450_v58 = vpop.f32.mrf.mxu1 }
 0x1cb   : > { %v864_v61 = vadd.f32 %v1450_v58, %v1811_v35  ;;  %v1012_v4 = vmul.f32 %v1325_v57, %v853_v53  ;;  %v1043_v38 = vmul.f32 %v1014_v23, %v861_v60 }
 0x1cc   : > { %v855_v63 = vpop.f32.mrf.mxu1 }
 0x1cd   : > { %v1391_v5 = vpack.c.bf16 %v864_v61, %v861_v60  ;;  %v856_v7 = vadd.f32 %v1811_v35, %v855_v63  ;;  %v1041_v13 = vmul.f32 %v1012_v4, %v853_v53  ;;  %v1023_v21 = vadd.f32 %v1022_v15, %v1012_v4 }
 0x1ce   : > { %v1015_v39 = vmul.f32 %v1328_v25, %v864_v61 }
 0x1cf   : > { %1410 = vst [vmem:[%s1825_s23 + $0x18] sm:$0xff] %v1391_v5   ;;  %v1386_v10 = vpack.c.bf16 %v856_v7, %v853_v53  ;;  %v1013_v11 = vmul.f32 %v1326_v0, %v856_v7  ;;  %v1052_v24 = vadd.f32 %v1051_v19, %v1041_v13 }
 0x1d0   : > { %v1044_v47 = vmul.f32 %v1015_v39, %v864_v61 }
 0x1d1   : > { %1409 = vst [vmem:[%s1825_s23 + $0x10] sm:$0xff] %v1386_v10   ;;  %v1042_v20 = vmul.f32 %v1013_v11, %v856_v7  ;;  %v1024_v26 = vadd.f32 %v1023_v21, %v1013_v11 }
 0x1d3   : > { %v1053_v31 = vadd.f32 %v1052_v24, %v1042_v20  ;;  %v1025_v40 = vadd.f32 %v1024_v26, %v1014_v23 }
 0x1d5   : > { %v1054_v42 = vadd.f32 %v1053_v31, %v1043_v38  ;;  %v1026_v50 = vadd.f32 %v1025_v40, %v1015_v39 }
 0x1d6   : > { %v1453_v27 = vpop.f32.mrf.mxu1 }
 0x1d7   : > { %v877_v43 = vadd.f32 %v1453_v27, %v1811_v35  ;;  %v1055_v53 = vadd.f32 %v1054_v42, %v1044_v47 }
 0x1d8   : > { %v868_v33 = vpop.f32.mrf.mxu1 }
 0x1d9   : > { %v869_v28 = vadd.f32 %v1811_v35, %v868_v33  ;;  %v1018_v55 = vmul.f32 %v1331_v18, %v877_v43 }
 0x1da   : > { %v1454_v41 = vpop.f32.mrf.mxu1 }
 0x1db   : > { %v1016_v44 = vmul.f32 %v1329_v34, %v869_v28  ;;  %v880_v45 = vadd.f32 %v1454_v41, %v1811_v35  ;;  %v1047_v63 = vmul.f32 %v1018_v55, %v877_v43 }
 0x1dc   : > { %v871_v46 = vpop.f32.mrf.mxu1 }
 0x1dd   : > { %v1401_v48 = vpack.c.bf16 %v880_v45, %v877_v43  ;;  %v1045_v51 = vmul.f32 %v1016_v44, %v869_v28  ;;  %v872_v52 = vadd.f32 %v1811_v35, %v871_v46  ;;  %v1027_v56 = vadd.f32 %v1026_v50, %v1016_v44 }
 0x1de   : > { %v1019_v60 = vmul.f32 %v1332_v54, %v880_v45 }
 0x1df   : > { %1412 = vst [vmem:[%s1825_s23 + $0x28] sm:$0xff] %v1401_v48   ;;  %v1396_v57 = vpack.c.bf16 %v872_v52, %v869_v28  ;;  %v1017_v58 = vmul.f32 %v1330_v49, %v872_v52  ;;  %v1056_v59 = vadd.f32 %v1055_v53, %v1045_v51 }
 0x1e0   : > { %v1048_v2 = vmul.f32 %v1019_v60, %v880_v45 }
 0x1e1   : > { %1411 = vst [vmem:[%s1825_s23 + $0x20] sm:$0xff] %v1396_v57   ;;  %v1028_v61 = vadd.f32 %v1027_v56, %v1017_v58  ;;  %v1046_v62 = vmul.f32 %v1017_v58, %v872_v52 }
 0x1e3   : > { %v1029_v0 = vadd.f32 %v1028_v61, %v1018_v55  ;;  %v1057_v1 = vadd.f32 %v1056_v59, %v1046_v62 }
 0x1e5   : > { %v1030_v3 = vadd.f32 %v1029_v0, %v1019_v60  ;;  %v1058_v4 = vadd.f32 %v1057_v1, %v1047_v63 }
 0x1e7   : > { %v1031_v35 = vrot.slane %v1030_v3, 4  ;;  %v1059_v5 = vadd.f32 %v1058_v4, %v1048_v2 }
 0x1e9   : > { %v1032_v6 = vadd.f32 %v1031_v35, %v1030_v3  ;;  %v1060_v7 = vrot.slane %v1059_v5, 4 }
 0x1eb   : > { %v1033_v37 = vrot.slane %v1032_v6, 2  ;;  %v1061_v8 = vadd.f32 %v1060_v7, %v1059_v5 }
 0x1ed   : > { %v1034_v9 = vadd.f32 %v1033_v37, %v1032_v6  ;;  %v1062_v10 = vrot.slane %v1061_v8, 2 }
 0x1ef   : > { %v1035_v11 = vrot.slane %v1034_v9, 1  ;;  %v1063_v12 = vadd.f32 %v1062_v10, %v1061_v8  ;;  %1069 = sbr.rel (%p1333_p9) target bundleno = 502 (0x1f6), region = 48 }
 0x1f1   : > { %v1036_v13 = vadd.f32 %v1035_v11, %v1034_v9  ;;  %v1064_v14 = vrot.slane %v1063_v12, 1 }
 0x1f3   : > { %v1065_v32 = vadd.f32 %v1064_v14, %v1063_v12 }
 0x1f4   : > { %1070 = vst [vmem:[%s1735_s16] sm:$0x1] %v1036_v13 }
 0x1f5   : > { %1071 = vst [vmem:[%s1735_s16 + $0x1] sm:$0x1] %v1065_v32 }
 0x1f6 PF: > { %p1334_p10 = scmp.eq.s32.totalorder %s1567_s24, 0 }
 0x1f8   : > { %1075 = sbr.rel (%p1334_p10) target bundleno = 513 (0x201), region = 52 }
 0x1fd   : > { %v1076_v15 = vld [vmem:[%s1735_s16] sm:$0x1]  ;;  %v1079_v16 = vld [vmem:[%s1735_s16 + $0x1] sm:$0x1] }
 0x1fe   : > { %v1077_v17 = vadd.f32 %v1076_v15, %v1036_v13  ;;  %v1080_v19 = vadd.f32 %v1079_v16, %v1065_v32 }
 0x200   : > { %1078 = vst [vmem:[%s1735_s16] sm:$0x1] %v1077_v17  ;;  %1081 = vst [vmem:[%s1735_s16 + $0x1] sm:$0x1] %v1080_v19 }
 0x201 PF: > { %s18_s30 = sadd.s32 1, %s1591_s30   ;;  %s1911_s24 = smov %s1579_s27 }
 0x202   : > { %p15_p11 = scmp.ge.s32.totalorder %s18_s30, 10   ;;  %s1912_s25 = smov %s1583_s28 }
 0x203   : > { %s1913_s26 = smov %s1587_s29  ;;  %s1914_s27 = smov %s1918_s8 }
 0x204   : > { %s1915_s28 = smov %s1922_s9  ;;  %s1916_s29 = smov %s1926_s10 }
 0x205   :  { %17 = sbr.rel (!%p15_p11) target bundleno = 4 (0x4), region = 100 }

// kernel: resblk_spade.3
= control target key start
LH: loop header
LB: loop body
LE: loop exit
PB: predicated region body
PF: predicated region fallthrough
CT: control target
= control target key end

     0   :  { %s2152_s17 = smov 0   ;;  %s2154_s18 = smov 0   ;;  %s2553_s0 = inlined_call_operand.vmem [shape: bf16[2,384,128], index: 0, kind: input, shape index: {}]   ;;  %s2554_s1 = inlined_call_operand.vmem [shape: bf16[2,384,128], index: 1, kind: input, shape index: {}]   ;;  %s2555_s2 = inlined_call_operand.vmem [shape: bf16[2,384,37], index: 2, kind: input, shape index: {}]   ;;  %s2556_s3 = inlined_call_operand.vmem [shape: f32[2,2,128], index: 3, kind: input, shape index: {}]   ;;  %s2557_s4 = inlined_call_operand.vmem [shape: f32[2,2,128], index: 4, kind: input, shape index: {}]   ;;  %s2558_s5 = inlined_call_operand.vmem [shape: bf16[37,256], index: 5, kind: input, shape index: {}]   ;;  %s2559_s6 = inlined_call_operand.vmem [shape: bf16[37,256], index: 6, kind: input, shape index: {}]   ;;  %s2560_s7 = inlined_call_operand.vmem [shape: bf16[128,128], index: 7, kind: input, shape index: {}]   ;;  %s2561_s8 = inlined_call_operand.vmem [shape: bf16[128,128], index: 8, kind: input, shape index: {}]   ;;  %s2562_s9 = inlined_call_operand.vmem [shape: f32[1,128], index: 9, kind: input, shape index: {}]   ;;  %s2563_s10 = inlined_call_operand.vmem [shape: f32[1,128], index: 10, kind: input, shape index: {}]   ;;  %s2564_s11 = inlined_call_operand.vmem [shape: bf16[2,384,128], index: 11, kind: output, shape index: {}]  }
   0x1   :  { %s2156_s19 = smov 0   ;;  %s2158_s20 = smov 0  }
   0x2   :  { %s2160_s21 = smov 0   ;;  %s2162_s22 = smov 0  }
   0x3   :  { %s2164_s23 = smov 0  }
   0x4 LB: > { %s33_s24 = sadd.s32 1, %s2076_s20  ;;  %s36_s25 = sadd.s32 1, %s2080_s21  ;;  %s2088_s23 = sphi %s2164_s23, %s21_s23   ;;  %s2084_s22 = sphi %s2162_s22, %s2572_s22   ;;  %s2080_s21 = sphi %s2160_s21, %s2571_s21   ;;  %s2076_s20 = sphi %s2158_s20, %s2570_s20   ;;  %s2072_s19 = sphi %s2156_s19, %s2569_s19   ;;  %s2068_s18 = sphi %s2154_s18, %s2568_s18   ;;  %s2064_s17 = sphi %s2152_s17, %s2567_s17  }
   0x5   : > { %p34_p0 = scmp.ge.s32.totalorder %s33_s24, 2  ;;  %p1675_p1 = scmp.ge.s32.totalorder %s2088_s23, 1 }
   0x6   : > { %p445_p2 = scmp.lt.s32.totalorder %s2088_s23, 9  ;;  %s40_s26 = sadd.s32 1, %s2084_s22 }
   0x7   : > { %s2574_s24 = smov (%p34_p0, %s33_s24), 0  ;;  %s2576_s25 = smov (!%p34_p0, %s36_s25), %s2080_s21 }
   0x8   : > { %p446_p3 = pnand %p1675_p1, %p445_p2  ;;  %p38_p4 = scmp.ge.s32.totalorder %s2576_s25, 2 }
   0x9   : > { %s1676_s12 = sshll.u32 (!%p446_p3), %s2068_s18, 1  ;;  %p530_p6 = scmp.lt.s32.totalorder (!%p446_p3), %s2072_s19, 1 }
   0xa   : > { %s2578_s25 = smov (%p38_p4, %s2576_s25), 0  ;;  %s2580_s26 = smov (!%p38_p4, %s40_s26), %s2084_s22 }
   0xb   : > { %p42_p5 = scmp.ge.s32.totalorder %s2580_s26, 2  ;;  %449 = sbr.rel (%p446_p3) target bundleno = 737 (0x2e1), region = 64 }
   0xc   : > { %s528_s15 = sadd.s32 (!%p446_p3), %s2064_s17, %s1676_s12 }
   0xd   : > { %s2582_s26 = smov (%p42_p5, %s2580_s26), 0  ;;  %s529_s30 = smul.u32 (!%p446_p3), 12, %s528_s15 }
   0xe   : > { %2565 = sst [smem:[#allocation2_spill]] %s2582_s26 }
   0xf   : > { %p532_p7 = scmp.lt.s32.totalorder (!%p446_p3), %s529_s30, 47 }
  0x10   : > { %v665_v0 = vld [vmem:[%s2558_s5 + $0x20] sm:$0x77]  ;;  %vm740_vm0 = vcmask 1041408   ;;  %vm741_vm1 = vcmask 1042432   ;;  %v629_v1 = vlaneseq  ;;  %v2090_v3 = vmov 65535   ;;  %v2010_v13 = vld [vmem:[%s2560_s7 + $0x38] sm:$0xff]  }
  0x11   : > { %v1697_v2 = vcombine.high %v665_v0, %v665_v0  ;;  %v742_v4 = vsel %vm740_vm0, 4294967295, %v2090_v3  ;;  %v1696_v5 = vcombine.low %v665_v0, %v665_v0  ;;  %v1998_v9 = vld [vmem:[%s2558_s5 + $0x14] ss:$8 sps:$4 sm:$0xff]   ;;  %v2091_v10 = vmov 0   ;;  %v2000_v12 = vld [vmem:[%s2558_s5 + $0x10] ss:$8 sps:$4 sm:$0xff]   ;;  %1881 = vmatprep.subr.bf16.mxu1 %v2010_v13 }
  0x12   : > { %v2203_v6 = vsel %vm741_vm1, %v742_v4, 0  ;;  %782 = vmatprep.mubr.bf16.mxu0 %v2091_v10  ;;  %v2213_v11 = vshrl.u32 %v629_v1, 7  ;;  %v2001_v14 = vld [vmem:[%s2558_s5 + $0x4] ss:$8 sps:$4 sm:$0xff]   ;;  %v2011_v17 = vld [vmem:[%s2560_s7 + $0x30] sm:$0xff]   ;;  %s2584_s19 = smov (!%p530_p6, %s2072_s19), 1  ;;  %1882 = vmatpush3.bf16.msra.mxu1 %v2010_v13 }
  0x13   : > { %v748_v7 = vand.u32 %v1697_v2, %v2203_v6  ;;  %v745_v8 = vand.u32 %v1696_v5, %v2203_v6  ;;  %v2012_v18 = vld [vmem:[%s2560_s7 + $0x28] sm:$0xff]   ;;  %s1937_s26 = smul.u32 48, %s2584_s19  ;;  %s1682_s15 = sshll.u32 %s2584_s19, 1  ;;  %1883 = vmatprep.subr.bf16.mxu1 %v2011_v17  ;;  %vm721_vm2 = vcmask 302080   ;;  %v2013_v29 = vld [vmem:[%s2560_s7 + $0x20] sm:$0xff]   ;;  %v2014_v30 = vld [vmem:[%s2560_s7 + $0x18] sm:$0xff]  }
  0x14   : > { %v631_v15 = vsub.s32 0, %v2213_v11  ;;  %v647_v16 = vsub.s32 1, %v2213_v11  ;;  %v2003_v19 = vld [vmem:[%s2558_s5] ss:$8 sps:$4 sm:$0xff]   ;;  %s2586_s30 = smov (!%p532_p7, %s529_s30), 47  ;;  %s576_s28 = scalar_lea.vmem %s2557_s4, %s1682_s15  ;;  %v2015_v31 = vld [vmem:[%s2560_s7 + $0x10] sm:$0xff]  }
  0x15   : > { %760 = vmatprep.subr.bf16.mxu0 %v748_v7  ;;  %s535_s29 = sadd.s32 %s1937_s26, %s2586_s30  ;;  %v1037_v20 = vld [vmem:[%s576_s28] sm:$0x3]  ;;  %v2016_v32 = vld [vmem:[%s2560_s7 + $0x8] sm:$0xff]   ;;  %s572_s27 = scalar_lea.vmem %s2556_s3, %s1682_s15 }
  0x16   : > { %761 = vmatpush1.bf16.msra.mxu0 %v745_v8  ;;  %1884 = vmatpush3.bf16.msra.mxu1 %v2011_v17  ;;  %s2246_s18 = sshll.u32 %s535_s29, 2  ;;  %v2250_v21 = vrot.slane %v1037_v20, %v631_v15  ;;  %v2254_v22 = vrot.slane %v1037_v20, %v647_v16  ;;  %v2017_v33 = vld [vmem:[%s2560_s7] sm:$0xff]  }
  0x17   : > { %762 = vmatprep.subr.bf16.mxu0 %v1998_v9  ;;  %1885 = vmatprep.subr.bf16.mxu1 %v2012_v18  ;;  %s565_s13 = scalar_lea.vmem %s2555_s2, %s2246_s18  ;;  %v1098_v34 = vld [vmem:[%s2559_s6 + $0x20] sm:$0x77]  ;;  %s2317_s17 = scalar_lea.vmem %s2553_s0, %s2246_s18 }
  0x18   : > { %v2260_v23 = vld [vmem:[%s565_s13] sm:$0xff]   ;;  %v2265_v24 = vld [vmem:[%s565_s13 + $0x8] sm:$0xff]   ;;  %v2270_v25 = vld [vmem:[%s565_s13 + $0x10] sm:$0xff]   ;;  %v1718_v35 = vcombine.high %v1098_v34, %v1098_v34  ;;  %s2398_s12 = scalar_lea.vmem %s2554_s1, %s2246_s18  ;;  %s2516_s28 = scalar_lea.vmem %s2564_s11, %s2246_s18 }
  0x19   : > { %v2275_v26 = vld [vmem:[%s565_s13 + $0x18] sm:$0xff]   ;;  %v2280_v27 = vld [vmem:[%s565_s13 + $0x20] sm:$0xff]   ;;  %v2285_v28 = vld [vmem:[%s565_s13 + $0x28] sm:$0xff]  }
  0x1a   : > { %763 = vmatpush1.bf16.msra.mxu0 %v2000_v12  ;;  %1886 = vmatpush3.bf16.msra.mxu1 %v2012_v18  ;;  %v1128_v36 = vand.u32 %v1718_v35, %v2203_v6  ;;  %v604_v37 = vld [vmem:[%s572_s27] sm:$0x3]  ;;  %v1838_v44 = vld [vmem:[%s2317_s17 + $0x8] sm:$0xff]   ;;  %v1839_v54 = vld [vmem:[%s2317_s17 + $0x10] sm:$0xff]   ;;  %v1717_v18 = vcombine.low %v1098_v34, %v1098_v34 }
  0x1b   : > { %764 = vmatprep.subr.bf16.mxu0 %v2001_v14  ;;  %1887 = vmatprep.subr.bf16.mxu1 %v2013_v29  ;;  %v1761_v38 = vld [vmem:[%s2317_s17] sm:$0xff]   ;;  %v2322_v39 = vrot.slane %v604_v37, %v631_v15  ;;  %v2326_v41 = vrot.slane %v604_v37, %v647_v16  ;;  %v1766_v47 = vunpack.c.l.bf16 %v1838_v44  ;;  %v1767_v49 = vunpack.c.h.bf16 %v1838_v44  ;;  %v1840_v8 = vld [vmem:[%s2317_s17 + $0x18] sm:$0xff]  }
  0x1c   : > { %v1762_v40 = vunpack.c.l.bf16 %v1761_v38  ;;  %v1763_v43 = vunpack.c.h.bf16 %v1761_v38  ;;  %v1770_v60 = vunpack.c.l.bf16 %v1839_v54  ;;  %v1771_v1 = vunpack.c.h.bf16 %v1839_v54  ;;  %v1841_v37 = vld [vmem:[%s2317_s17 + $0x20] sm:$0xff]  }
  0x1d   : > { %v635_v52 = vsub.f32 %v1766_v47, %v2322_v39  ;;  %v636_v56 = vsub.f32 %v1767_v49, %v2322_v39  ;;  %v1774_v16 = vunpack.c.l.bf16 %v1840_v8  ;;  %v1125_v38 = vand.u32 %v1717_v18, %v2203_v6  ;;  %v2020_v6 = vld [vmem:[%s2559_s6 + $0x10] ss:$8 sps:$4 sm:$0xff]  }
  0x1e   : > { %765 = vmatpush1.bf16.msra.mxu0 %v2003_v19  ;;  %1888 = vmatpush3.bf16.msra.mxu1 %v2013_v29  ;;  %v633_v42 = vsub.f32 %v1762_v40, %v2322_v39  ;;  %v634_v46 = vsub.f32 %v1763_v43, %v2322_v39  ;;  %v637_v5 = vsub.f32 %v1770_v60, %v2322_v39  ;;  %v1778_v47 = vunpack.c.l.bf16 %v1841_v37  ;;  %v2023_v60 = vld [vmem:[%s2559_s6] ss:$8 sps:$4 sm:$0xff]  }
  0x1f   : > { %1889 = vmatprep.subr.bf16.mxu1 %v2014_v30  ;;  %v651_v59 = vmul.f32 %v2326_v41, %v635_v52  ;;  %v652_v0 = vmul.f32 %v2326_v41, %v636_v56  ;;  %v638_v12 = vsub.f32 %v1771_v1, %v2322_v39  ;;  %v639_v35 = vsub.f32 %v1774_v16, %v2322_v39 }
  0x20   : > { %v649_v45 = vmul.f32 %v2326_v41, %v633_v42  ;;  %v650_v51 = vmul.f32 %v2326_v41, %v634_v46  ;;  %v653_v15 = vmul.f32 %v2326_v41, %v637_v5  ;;  %v2022_v42 = vld [vmem:[%s2559_s6 + $0x14] ss:$8 sps:$4 sm:$0xff]  }
  0x21   : > { %1698 = vmatmul.mubr.msk.bf16.vlgmr.msra.gmra.mxu0 %vm721_vm2, %v2260_v23  ;;  %v654_v29 = vmul.f32 %v2326_v41, %v638_v12  ;;  %v655_v46 = vmul.f32 %v2326_v41, %v639_v35 }
  0x22   : > { %792 = vmatprep.mubr.bf16.mxu0 %v2091_v10  ;;  %1890 = vmatpush3.bf16.msra.mxu1 %v2014_v30  ;;  %v1775_v30 = vunpack.c.h.bf16 %v1840_v8 }
  0x23   : > { %1891 = vmatprep.subr.bf16.mxu1 %v2015_v31 }
  0x24   : > { %v640_v43 = vsub.f32 %v1775_v30, %v2322_v39 }
  0x26   : > { %1892 = vmatpush3.bf16.msra.mxu1 %v2015_v31  ;;  %v656_v52 = vmul.f32 %v2326_v41, %v640_v43 }
  0x27   : > { %1893 = vmatprep.subr.bf16.mxu1 %v2016_v32 }
  0x29   : > { %1699 = vmatmul.mubr.msk.bf16.gmra.mxu0 %vm721_vm2, %v2265_v24 }
  0x2a   : > { %802 = vmatprep.mubr.bf16.mxu0 %v2091_v10  ;;  %1894 = vmatpush3.bf16.msra.mxu1 %v2016_v32 }
  0x2b   : > { %1895 = vmatprep.subr.bf16.mxu1 %v2017_v33 }
  0x2e   : > { %1896 = vmatpush3.bf16.msra.mxu1 %v2017_v33 }
  0x2f   : > { %1140 = vmatprep.subr.bf16.mxu1 %v1128_v36 }
  0x31   : > { %1700 = vmatmul.mubr.msk.bf16.gmra.mxu0 %vm721_vm2, %v2270_v25 }
  0x32   : > { %812 = vmatprep.mubr.bf16.mxu0 %v2091_v10 }
  0x39   : > { %1701 = vmatmul.mubr.msk.bf16.gmra.mxu0 %vm721_vm2, %v2275_v26 }
  0x3a   : > { %822 = vmatprep.mubr.bf16.mxu0 %v2091_v10 }
  0x41   : > { %1702 = vmatmul.mubr.msk.bf16.gmra.mxu0 %vm721_vm2, %v2280_v27 }
  0x42   : > { %832 = vmatprep.mubr.bf16.mxu0 %v2091_v10 }
  0x49   : > { %1703 = vmatmul.mubr.msk.bf16.gmra.mxu0 %vm721_vm2, %v2285_v28 }
  0xe1   : > { %v784_v48 = vpop.f32.mrf.mxu0 }
  0xe2   : > { %v843_v50 = vmul.f32 %v784_v48, %v649_v45 }
  0xe3   : > { %v786_v53 = vpop.f32.mrf.mxu0 }
  0xe4   : > { %v855_v57 = vadd.f32 %v843_v50, %v786_v53  ;;  %v2025_v50 = vld [vmem:[%s2559_s6 + $0x4] ss:$8 sps:$4 sm:$0xff]   ;;  %v1779_v53 = vunpack.c.h.bf16 %v1841_v37 }
  0xe5   : > { %v788_v55 = vpop.f32.mrf.mxu0 }
  0xe6   : > { %v844_v58 = vmul.f32 %v788_v55, %v650_v51  ;;  %v867_v2 = vmax.f32 %v855_v57, 0.0  ;;  %v641_v57 = vsub.f32 %v1778_v47, %v2322_v39 }
  0xe7   : > { %v790_v61 = vpop.f32.mrf.mxu0 }
  0xe8   : > { %v856_v62 = vadd.f32 %v844_v58, %v790_v61  ;;  %v1842_v58 = vld [vmem:[%s2317_s17 + $0x28] sm:$0xff]  }
  0xe9   : > { %v794_v63 = vpop.f32.mrf.mxu0 }
  0xea   : > { %v868_v3 = vmax.f32 %v856_v62, 0.0  ;;  %v845_v4 = vmul.f32 %v794_v63, %v651_v59  ;;  %v642_v63 = vsub.f32 %v1779_v53, %v2322_v39 }
  0xeb   : > { %v796_v7 = vpop.f32.mrf.mxu0 }
  0xec   : > { %v879_v9 = vpack.c.bf16 %v868_v3, %v867_v2  ;;  %v857_v13 = vadd.f32 %v845_v4, %v796_v7  ;;  %v657_v3 = vmul.f32 %v2326_v41, %v641_v57  ;;  %v658_v8 = vmul.f32 %v2326_v41, %v642_v63 }
  0xed   : > { %v798_v11 = vpop.f32.mrf.mxu0 }
  0xee   : > { %v846_v14 = vmul.f32 %v798_v11, %v652_v0  ;;  %1897 = vmatprep.mubr.bf16.mxu1 %v879_v9  ;;  %v869_v31 = vmax.f32 %v857_v13, 0.0  ;;  %v1782_v0 = vunpack.c.l.bf16 %v1842_v58 }
  0xef   : > { %v800_v17 = vpop.f32.mrf.mxu0 }
  0xf0   : > { %v858_v19 = vadd.f32 %v846_v14, %v800_v17  ;;  %v643_v9 = vsub.f32 %v1782_v0, %v2322_v39  ;;  %v1783_v14 = vunpack.c.h.bf16 %v1842_v58  ;;  %v1844_v58 = vld [vmem:[%s2398_s12 + $0x10] sm:$0xff]   ;;  %v2033_v0 = vld [vmem:[%s2561_s8] sm:$0xff]  }
  0xf1   : > { %v804_v20 = vpop.f32.mrf.mxu0 }
  0xf2   : > { %v870_v32 = vmax.f32 %v858_v19, 0.0  ;;  %v847_v33 = vmul.f32 %v804_v20, %v653_v15  ;;  %v659_v20 = vmul.f32 %v2326_v41, %v643_v9 }
  0xf3   : > { %v806_v36 = vpop.f32.mrf.mxu0 }
  0xf4   : > { %v880_v40 = vpack.c.bf16 %v870_v32, %v869_v31  ;;  %v859_v44 = vadd.f32 %v847_v33, %v806_v36 }
  0xf5   : > { %v808_v34 = vpop.f32.mrf.mxu0 }
  0xf6   : > { %v848_v45 = vmul.f32 %v808_v34, %v654_v29  ;;  %1898 = vmatmul.mubr.bf16.vlgmr.msra.gmra.mxu1 %v880_v40  ;;  %v871_v54 = vmax.f32 %v859_v44, 0.0  ;;  %v644_v29 = vsub.f32 %v1783_v14, %v2322_v39  ;;  %v2029_v39 = vld [vmem:[%s2561_s8 + $0x20] sm:$0xff]  }
  0xf7   : > { %v810_v48 = vpop.f32.mrf.mxu0  ;;  %1141 = vmatpush1.bf16.msra.mxu1 %v1125_v38 }
  0xf8   : > { %v860_v49 = vadd.f32 %v848_v45, %v810_v48  ;;  %1142 = vmatprep.subr.bf16.mxu1 %v2022_v42  ;;  %v660_v37 = vmul.f32 %v2326_v41, %v644_v29 }
  0xf9   : > { %v814_v51 = vpop.f32.mrf.mxu0 }
  0xfa   : > { %v872_v55 = vmax.f32 %v860_v49, 0.0  ;;  %v849_v56 = vmul.f32 %v814_v51, %v655_v46  ;;  %v1843_v49 = vld [vmem:[%s2398_s12 + $0x8] sm:$0xff]   ;;  %v2030_v51 = vld [vmem:[%s2561_s8 + $0x18] sm:$0xff]  }
  0xfb   : > { %v816_v59 = vpop.f32.mrf.mxu0  ;;  %1143 = vmatpush1.bf16.msra.mxu1 %v2020_v6 }
  0xfc   : > { %v881_v61 = vpack.c.bf16 %v872_v55, %v871_v54  ;;  %1144 = vmatprep.subr.bf16.mxu1 %v2025_v50  ;;  %v861_v1 = vadd.f32 %v849_v56, %v816_v59  ;;  %v2031_v55 = vld [vmem:[%s2561_s8 + $0x10] sm:$0xff]   ;;  %v1791_v56 = vunpack.c.h.bf16 %v1843_v49 }
  0xfd   : > { %v818_v62 = vpop.f32.mrf.mxu0 }
  0xfe   : > { %v850_v2 = vmul.f32 %v818_v62, %v656_v52  ;;  %1901 = vmatprep.mubr.bf16.mxu1 %v881_v61  ;;  %v873_v11 = vmax.f32 %v861_v1, 0.0  ;;  %v1790_v52 = vunpack.c.l.bf16 %v1843_v49  ;;  %v1069_v57 = vsub.f32 %v1791_v56, %v2250_v21 }
  0xff   : > { %v820_v4 = vpop.f32.mrf.mxu0  ;;  %1145 = vmatpush1.bf16.msra.mxu1 %v2023_v60  ;;  %v2032_v60 = vld [vmem:[%s2561_s8 + $0x8] sm:$0xff]   ;;  %v1794_v61 = vunpack.c.l.bf16 %v1844_v58  ;;  %v1795_v1 = vunpack.c.h.bf16 %v1844_v58 }
 0x100   : > { %v862_v5 = vadd.f32 %v850_v2, %v820_v4  ;;  %v1068_v53 = vsub.f32 %v1790_v52, %v2250_v21  ;;  %v1085_v59 = vmul.f32 %v2254_v22, %v1069_v57 }
 0x101   : > { %v824_v7 = vpop.f32.mrf.mxu0  ;;  %v1070_v62 = vsub.f32 %v1794_v61, %v2250_v21  ;;  %v1071_v2 = vsub.f32 %v1795_v1, %v2250_v21 }
 0x102   : > { %v874_v12 = vmax.f32 %v862_v5, 0.0  ;;  %v851_v13 = vmul.f32 %v824_v7, %v657_v3  ;;  %v2421_v54 = vmul.f32 %v2254_v22, %v1068_v53  ;;  %v1845_v3 = vld [vmem:[%s2398_s12 + $0x18] sm:$0xff]  }
 0x103   : > { %v826_v15 = vpop.f32.mrf.mxu0  ;;  %v2434_v63 = vmul.f32 %v2254_v22, %v1070_v62  ;;  %v1087_v4 = vmul.f32 %v2254_v22, %v1071_v2  ;;  %v1798_v5 = vunpack.c.l.bf16 %v1845_v3  ;;  %v1799_v9 = vunpack.c.h.bf16 %v1845_v3 }
 0x104   : > { %v882_v16 = vpack.c.bf16 %v874_v12, %v873_v11  ;;  %v863_v18 = vadd.f32 %v851_v13, %v826_v15  ;;  %v1846_v12 = vld [vmem:[%s2398_s12 + $0x20] sm:$0xff]  }
 0x105   : > { %v828_v17 = vpop.f32.mrf.mxu0  ;;  %v1072_v7 = vsub.f32 %v1798_v5, %v2250_v21  ;;  %v1073_v11 = vsub.f32 %v1799_v9, %v2250_v21  ;;  %v1802_v14 = vunpack.c.l.bf16 %v1846_v12 }
 0x106   : > { %v852_v19 = vmul.f32 %v828_v17, %v658_v8  ;;  %1902 = vmatmul.mubr.bf16.gmra.mxu1 %v882_v16  ;;  %v875_v33 = vmax.f32 %v863_v18, 0.0  ;;  %v1803_v17 = vunpack.c.h.bf16 %v1846_v12 }
 0x107   : > { %v830_v30 = vpop.f32.mrf.mxu0  ;;  %v2444_v8 = vmul.f32 %v2254_v22, %v1072_v7  ;;  %v2449_v13 = vmul.f32 %v2254_v22, %v1073_v11  ;;  %v1074_v15 = vsub.f32 %v1802_v14, %v2250_v21 }
 0x108   : > { %v864_v31 = vadd.f32 %v852_v19, %v830_v30  ;;  %v1075_v18 = vsub.f32 %v1803_v17, %v2250_v21  ;;  %v1847_v19 = vld [vmem:[%s2398_s12 + $0x28] sm:$0xff]  }
 0x109   : > { %v834_v32 = vpop.f32.mrf.mxu0  ;;  %v2453_v16 = vmul.f32 %v2254_v22, %v1074_v15  ;;  %v1806_v29 = vunpack.c.l.bf16 %v1847_v19 }
 0x10a   : > { %v876_v35 = vmax.f32 %v864_v31, 0.0  ;;  %v853_v36 = vmul.f32 %v834_v32, %v659_v20  ;;  %v2458_v20 = vmul.f32 %v2254_v22, %v1075_v18  ;;  %v1807_v32 = vunpack.c.h.bf16 %v1847_v19 }
 0x10b   : > { %v836_v38 = vpop.f32.mrf.mxu0  ;;  %v1076_v30 = vsub.f32 %v1806_v29, %v2250_v21 }
 0x10c   : > { %v883_v40 = vpack.c.bf16 %v876_v35, %v875_v33  ;;  %v865_v34 = vadd.f32 %v853_v36, %v836_v38  ;;  %v1077_v33 = vsub.f32 %v1807_v32, %v2250_v21 }
 0x10d   : > { %v838_v42 = vpop.f32.mrf.mxu0  ;;  %v2462_v31 = vmul.f32 %v2254_v22, %v1076_v30 }
 0x10e   : > { %v854_v43 = vmul.f32 %v838_v42, %v660_v37  ;;  %1905 = vmatprep.mubr.bf16.mxu1 %v883_v40  ;;  %v877_v46 = vmax.f32 %v865_v34, 0.0  ;;  %v2466_v35 = vmul.f32 %v2254_v22, %v1077_v33 }
 0x10f   : > { %v840_v44 = vpop.f32.mrf.mxu0 }
 0x110   : > { %v866_v45 = vadd.f32 %v854_v43, %v840_v44 }
 0x112   : > { %v878_v47 = vmax.f32 %v866_v45, 0.0 }
 0x114   : > { %v884_v48 = vpack.c.bf16 %v878_v47, %v877_v46 }
 0x116   : > { %1906 = vmatmul.mubr.bf16.gmra.mxu1 %v884_v48 }
 0x117   : > { %1162 = vmatprep.mubr.bf16.mxu1 %v2091_v10 }
 0x11e   : > { %1719 = vmatmul.mubr.msk.bf16.vlgmr.msra.gmra.mxu1 %vm721_vm2, %v2260_v23  ;;  %v2026_v23 = vld [vmem:[%s2561_s8 + $0x38] sm:$0xff]  }
 0x11f   : > { %1172 = vmatprep.mubr.bf16.mxu1 %v2091_v10  ;;  %1909 = vmatprep.subr.bf16.mxu0 %v2026_v23 }
 0x120   : > { %1910 = vmatpush3.bf16.msra.mxu0 %v2026_v23 }
 0x126   : > { %1720 = vmatmul.mubr.msk.bf16.gmra.mxu1 %vm721_vm2, %v2265_v24  ;;  %v2027_v24 = vld [vmem:[%s2561_s8 + $0x30] sm:$0xff]  }
 0x127   : > { %1182 = vmatprep.mubr.bf16.mxu1 %v2091_v10  ;;  %1911 = vmatprep.subr.bf16.mxu0 %v2027_v24 }
 0x128   : > { %1912 = vmatpush3.bf16.msra.mxu0 %v2027_v24 }
 0x12e   : > { %1721 = vmatmul.mubr.msk.bf16.gmra.mxu1 %vm721_vm2, %v2270_v25  ;;  %v2028_v25 = vld [vmem:[%s2561_s8 + $0x28] sm:$0xff]  }
 0x12f   : > { %1192 = vmatprep.mubr.bf16.mxu1 %v2091_v10  ;;  %1913 = vmatprep.subr.bf16.mxu0 %v2028_v25 }
 0x130   : > { %1914 = vmatpush3.bf16.msra.mxu0 %v2028_v25 }
 0x131   : > { %1915 = vmatprep.subr.bf16.mxu0 %v2029_v39 }
 0x134   : > { %1916 = vmatpush3.bf16.msra.mxu0 %v2029_v39 }
 0x135   : > { %1917 = vmatprep.subr.bf16.mxu0 %v2030_v51 }
 0x136   : > { %1722 = vmatmul.mubr.msk.bf16.gmra.mxu1 %vm721_vm2, %v2275_v26 }
 0x137   : > { %1202 = vmatprep.mubr.bf16.mxu1 %v2091_v10 }
 0x138   : > { %1918 = vmatpush3.bf16.msra.mxu0 %v2030_v51 }
 0x139   : > { %1919 = vmatprep.subr.bf16.mxu0 %v2031_v55 }
 0x13c   : > { %1920 = vmatpush3.bf16.msra.mxu0 %v2031_v55 }
 0x13d   : > { %1921 = vmatprep.subr.bf16.mxu0 %v2032_v60 }
 0x13e   : > { %1723 = vmatmul.mubr.msk.bf16.gmra.mxu1 %vm721_vm2, %v2280_v27 }
 0x13f   : > { %1212 = vmatprep.mubr.bf16.mxu1 %v2091_v10  ;;  %v1785_v10 = vld [vmem:[%s2398_s12] sm:$0xff]  }
 0x140   : > { %v1786_v26 = vunpack.c.l.bf16 %v1785_v10  ;;  %v1787_v41 = vunpack.c.h.bf16 %v1785_v10  ;;  %1922 = vmatpush3.bf16.msra.mxu0 %v2032_v60 }
 0x141   : > { %1923 = vmatprep.subr.bf16.mxu0 %v2033_v0 }
 0x142   : > { %v1066_v27 = vsub.f32 %v1786_v26, %v2250_v21  ;;  %v1067_v6 = vsub.f32 %v1787_v41, %v2250_v21 }
 0x144   : > { %v2414_v50 = vmul.f32 %v2254_v22, %v1067_v6  ;;  %1924 = vmatpush3.bf16.msra.mxu0 %v2033_v0 }
 0x146   : > { %1724 = vmatmul.mubr.msk.bf16.gmra.mxu1 %vm721_vm2, %v2285_v28  ;;  %v2406_v28 = vmul.f32 %v2254_v22, %v1066_v27 }
 0x1b6   : > { %v2468_v36 = vpop.f32.mrf.mxu1 }
 0x1b8   : > { %v2470_v37 = vpop.f32.mrf.mxu1 }
 0x1ba   : > { %v2472_v38 = vpop.f32.mrf.mxu1 }
 0x1bc   : > { %v2474_v40 = vpop.f32.mrf.mxu1 }
 0x1c6   : > { %v2476_v42 = vpop.f32.mrf.mxu1 }
 0x1c8   : > { %v2478_v34 = vpop.f32.mrf.mxu1 }
 0x1ca   : > { %v2480_v43 = vpop.f32.mrf.mxu1 }
 0x1cc   : > { %v2482_v44 = vpop.f32.mrf.mxu1 }
 0x1d6   : > { %v2484_v21 = vpop.f32.mrf.mxu1 }
 0x1d8   : > { %v2486_v22 = vpop.f32.mrf.mxu1 }
 0x1da   : > { %v2488_v45 = vpop.f32.mrf.mxu1 }
 0x1dc   : > { %v2490_v46 = vpop.f32.mrf.mxu1 }
 0x1de   : > { %v1164_v47 = vpop.f32.mrf.mxu1 }
 0x1df   : > { %v1223_v48 = vmul.f32 %v1164_v47, %v2406_v28 }
 0x1e0   : > { %v1166_v23 = vpop.f32.mrf.mxu1 }
 0x1e1   : > { %v1235_v10 = vadd.f32 %v1223_v48, %v1166_v23 }
 0x1e2   : > { %v1168_v24 = vpop.f32.mrf.mxu1 }
 0x1e3   : > { %v1224_v25 = vmul.f32 %v1168_v24, %v2414_v50  ;;  %v1247_v41 = vmax.f32 %v1235_v10, 0.0 }
 0x1e4   : > { %v1170_v26 = vpop.f32.mrf.mxu1 }
 0x1e5   : > { %v1236_v27 = vadd.f32 %v1224_v25, %v1170_v26 }
 0x1e6   : > { %v1174_v39 = vpop.f32.mrf.mxu1 }
 0x1e7   : > { %v1248_v6 = vmax.f32 %v1236_v27, 0.0  ;;  %v1225_v49 = vmul.f32 %v1174_v39, %v2421_v54 }
 0x1e8   : > { %v1176_v51 = vpop.f32.mrf.mxu1 }
 0x1e9   : > { %v1259_v52 = vpack.c.bf16 %v1248_v6, %v1247_v41  ;;  %v1237_v55 = vadd.f32 %v1225_v49, %v1176_v51 }
 0x1ea   : > { %v1178_v53 = vpop.f32.mrf.mxu1 }
 0x1eb   : > { %v1226_v56 = vmul.f32 %v1178_v53, %v1085_v59  ;;  %1925 = vmatprep.mubr.bf16.mxu0 %v1259_v52  ;;  %v1249_v60 = vmax.f32 %v1237_v55, 0.0 }
 0x1ec   : > { %v1180_v57 = vpop.f32.mrf.mxu1 }
 0x1ed   : > { %v1238_v28 = vadd.f32 %v1226_v56, %v1180_v57  ;;  %v1704_v56 = vld [vmem:[%s2562_s9] ss:$0 sm:$0xff] }
 0x1ee   : > { %v1184_v58 = vpop.f32.mrf.mxu1 }
 0x1ef   : > { %v1250_v61 = vmax.f32 %v1238_v28, 0.0  ;;  %v1227_v50 = vmul.f32 %v1184_v58, %v2434_v63  ;;  %v991_v58 = vadd.f32 %v1704_v56, %v2470_v37 }
 0x1f0   : > { %v1186_v62 = vpop.f32.mrf.mxu1 }
 0x1f1   : > { %v1260_v0 = vpack.c.bf16 %v1250_v61, %v1249_v60  ;;  %v1239_v2 = vadd.f32 %v1227_v50, %v1186_v62  ;;  %v1733_v61 = vld [vmem:[%s2563_s10] ss:$0 sm:$0xff]  ;;  %v994_v62 = vadd.f32 %v1704_v56, %v2474_v40 }
 0x1f2   : > { %v1188_v1 = vpop.f32.mrf.mxu1 }
 0x1f3   : > { %v1228_v3 = vmul.f32 %v1188_v1, %v1087_v4  ;;  %1926 = vmatmul.mubr.bf16.vlgmr.msra.gmra.mxu0 %v1260_v0  ;;  %v1251_v9 = vmax.f32 %v1239_v2, 0.0 }
 0x1f4   : > { %v1190_v54 = vpop.f32.mrf.mxu1 }
 0x1f5   : > { %v1240_v5 = vadd.f32 %v1228_v3, %v1190_v54 }
 0x1f6   : > { %v1194_v7 = vpop.f32.mrf.mxu1 }
 0x1f7   : > { %v1252_v11 = vmax.f32 %v1240_v5, 0.0  ;;  %v1229_v59 = vmul.f32 %v1194_v7, %v2444_v8 }
 0x1f8   : > { %v1196_v12 = vpop.f32.mrf.mxu1 }
 0x1f9   : > { %v1261_v14 = vpack.c.bf16 %v1252_v11, %v1251_v9  ;;  %v1241_v17 = vadd.f32 %v1229_v59, %v1196_v12  ;;  %v1015_v9 = vadd.f32 %v2476_v42, %v1704_v56  ;;  %v1007_v59 = vadd.f32 %v1704_v56, %v2478_v34 }
 0x1fa   : > { %v1198_v15 = vpop.f32.mrf.mxu1  ;;  %v1018_v12 = vadd.f32 %v2480_v43, %v1704_v56 }
 0x1fb   : > { %v1230_v18 = vmul.f32 %v1198_v15, %v2449_v13  ;;  %1929 = vmatprep.mubr.bf16.mxu0 %v1261_v14  ;;  %v1253_v30 = vmax.f32 %v1241_v17, 0.0  ;;  %v1010_v17 = vadd.f32 %v1704_v56, %v2482_v44  ;;  %v1034_v44 = vadd.f32 %v2488_v45, %v1704_v56 }
 0x1fc   : > { %v1200_v63 = vpop.f32.mrf.mxu1 }
 0x1fd   : > { %v1242_v19 = vadd.f32 %v1230_v18, %v1200_v63 }
 0x1fe   : > { %v1204_v29 = vpop.f32.mrf.mxu1 }
 0x1ff   : > { %v1254_v4 = vmax.f32 %v1242_v19, 0.0  ;;  %v1231_v32 = vmul.f32 %v1204_v29, %v2453_v16 }
 0x200   : > { %v1206_v33 = vpop.f32.mrf.mxu1 }
 0x201   : > { %v1262_v47 = vpack.c.bf16 %v1254_v4, %v1253_v30  ;;  %v1243_v23 = vadd.f32 %v1231_v32, %v1206_v33 }
 0x202   : > { %v1208_v48 = vpop.f32.mrf.mxu1 }
 0x203   : > { %v1232_v8 = vmul.f32 %v1208_v48, %v2458_v20  ;;  %1930 = vmatmul.mubr.bf16.gmra.mxu0 %v1262_v47  ;;  %v1255_v26 = vmax.f32 %v1243_v23, 0.0  ;;  %v1031_v48 = vadd.f32 %v2484_v21, %v1704_v56  ;;  %v1023_v23 = vadd.f32 %v1704_v56, %v2486_v22 }
 0x204   : > { %v1210_v24 = vpop.f32.mrf.mxu1 }
 0x205   : > { %v1244_v10 = vadd.f32 %v1232_v8, %v1210_v24 }
 0x206   : > { %v1214_v25 = vpop.f32.mrf.mxu1 }
 0x207   : > { %v1256_v13 = vmax.f32 %v1244_v10, 0.0  ;;  %v1233_v27 = vmul.f32 %v1214_v25, %v2462_v31  ;;  %v999_v31 = vadd.f32 %v2468_v36, %v1704_v56  ;;  %v1026_v10 = vadd.f32 %v1704_v56, %v2490_v46 }
 0x208   : > { %v1216_v39 = vpop.f32.mrf.mxu1 }
 0x209   : > { %v1263_v41 = vpack.c.bf16 %v1256_v13, %v1255_v26  ;;  %v1245_v49 = vadd.f32 %v1233_v27, %v1216_v39 }
 0x20a   : > { %v1218_v6 = vpop.f32.mrf.mxu1 }
 0x20b   : > { %v1234_v16 = vmul.f32 %v1218_v6, %v2466_v35  ;;  %1933 = vmatprep.mubr.bf16.mxu0 %v1263_v41  ;;  %v1257_v53 = vmax.f32 %v1245_v49, 0.0  ;;  %v1002_v35 = vadd.f32 %v2472_v38, %v1704_v56 }
 0x20c   : > { %v1220_v51 = vpop.f32.mrf.mxu1 }
 0x20d   : > { %v1246_v52 = vadd.f32 %v1234_v16, %v1220_v51 }
 0x20f   : > { %v1258_v55 = vmax.f32 %v1246_v52, 0.0 }
 0x211   : > { %v1264_v20 = vpack.c.bf16 %v1258_v55, %v1257_v53 }
 0x213   : > { %1934 = vmatmul.mubr.bf16.gmra.mxu0 %v1264_v20 }
 0x2b3   : > { %v1927_v57 = vpop.f32.mrf.mxu0 }
 0x2b4   : > { %v1412_v60 = vadd.f32 %v1927_v57, %v999_v31 }
 0x2b5   : > { %v1363_v28 = vpop.f32.mrf.mxu0 }
 0x2b6   : > { %v1410_v0 = vadd.f32 %v1363_v28, %v991_v58  ;;  %v1431_v3 = vadd.f32 %v1733_v61, %v1412_v60 }
 0x2b7   : > { %v1928_v50 = vpop.f32.mrf.mxu0 }
 0x2b8   : > { %v1413_v1 = vadd.f32 %v1928_v50, %v1002_v35  ;;  %v1429_v36 = vadd.f32 %v1733_v61, %v1410_v0 }
 0x2b9   : > { %v1366_v2 = vpop.f32.mrf.mxu0 }
 0x2ba   : > { %v1432_v54 = vadd.f32 %v1733_v61, %v1413_v1  ;;  %v1411_v5 = vadd.f32 %v1366_v2, %v994_v62 }
 0x2bc   : > { %v1816_v37 = vpack.c.bf16 %v1432_v54, %v1431_v3  ;;  %v1430_v38 = vadd.f32 %v1733_v61, %v1411_v5 }
 0x2be   : > { %1848 = vst [vmem:[%s2516_s28 + $0x8] sm:$0xff] %v1816_v37   ;;  %v1811_v7 = vpack.c.bf16 %v1430_v38, %v1429_v36 }
 0x2c0   : > { %1812 = vst [vmem:[%s2516_s28] sm:$0xff] %v1811_v7  }
 0x2c3   : > { %v1931_v40 = vpop.f32.mrf.mxu0 }
 0x2c4   : > { %v1416_v14 = vadd.f32 %v1931_v40, %v1015_v9 }
 0x2c5   : > { %v1379_v11 = vpop.f32.mrf.mxu0 }
 0x2c6   : > { %v1414_v18 = vadd.f32 %v1379_v11, %v1007_v59  ;;  %v1435_v29 = vadd.f32 %v1733_v61, %v1416_v14 }
 0x2c7   : > { %v1932_v15 = vpop.f32.mrf.mxu0 }
 0x2c8   : > { %v1417_v63 = vadd.f32 %v1932_v15, %v1018_v12  ;;  %v1433_v32 = vadd.f32 %v1733_v61, %v1414_v18 }
 0x2c9   : > { %v1382_v19 = vpop.f32.mrf.mxu0 }
 0x2ca   : > { %v1436_v30 = vadd.f32 %v1733_v61, %v1417_v63  ;;  %v1415_v4 = vadd.f32 %v1382_v19, %v1010_v17 }
 0x2cc   : > { %v1826_v33 = vpack.c.bf16 %v1436_v30, %v1435_v29  ;;  %v1434_v42 = vadd.f32 %v1733_v61, %v1415_v4 }
 0x2ce   : > { %1850 = vst [vmem:[%s2516_s28 + $0x18] sm:$0xff] %v1826_v33   ;;  %v1821_v47 = vpack.c.bf16 %v1434_v42, %v1433_v32 }
 0x2d0   : > { %1849 = vst [vmem:[%s2516_s28 + $0x10] sm:$0xff] %v1821_v47  }
 0x2d3   : > { %v1935_v34 = vpop.f32.mrf.mxu0 }
 0x2d4   : > { %v1420_v8 = vadd.f32 %v1935_v34, %v1031_v48 }
 0x2d5   : > { %v1395_v43 = vpop.f32.mrf.mxu0 }
 0x2d6   : > { %v1418_v25 = vadd.f32 %v1395_v43, %v1023_v23  ;;  %v1439_v27 = vadd.f32 %v1733_v61, %v1420_v8 }
 0x2d7   : > { %v1936_v24 = vpop.f32.mrf.mxu0 }
 0x2d8   : > { %v1421_v26 = vadd.f32 %v1936_v24, %v1034_v44  ;;  %v1437_v6 = vadd.f32 %v1733_v61, %v1418_v25 }
 0x2d9   : > { %v1398_v13 = vpop.f32.mrf.mxu0 }
 0x2da   : > { %v1440_v39 = vadd.f32 %v1733_v61, %v1421_v26  ;;  %v1419_v41 = vadd.f32 %v1398_v13, %v1026_v10 }
 0x2dc   : > { %v1836_v49 = vpack.c.bf16 %v1440_v39, %v1439_v27  ;;  %v1438_v21 = vadd.f32 %v1733_v61, %v1419_v41 }
 0x2de   : > { %1852 = vst [vmem:[%s2516_s28 + $0x28] sm:$0xff] %v1836_v49   ;;  %v1831_v16 = vpack.c.bf16 %v1438_v21, %v1437_v6 }
 0x2e0   : > { %1851 = vst [vmem:[%s2516_s28 + $0x20] sm:$0xff] %v1831_v16  }
 0x2e1 PF: > { %s21_s23 = sadd.s32 1, %s2088_s23   ;;  %s2566_s29 = sld [smem:[#allocation2_spill]] }
 0x2e2   : > { %p18_p8 = scmp.ge.s32.totalorder %s21_s23, 10   ;;  %s2567_s17 = smov %s2076_s20 }
 0x2e3   : > { %s2568_s18 = smov %s2080_s21  ;;  %s2569_s19 = smov %s2084_s22 }
 0x2e4   : > { %s2570_s20 = smov %s2574_s24  ;;  %s2571_s21 = smov %s2578_s25 }
 0x2e5   :  { %20 = sbr.rel (!%p18_p8) target bundleno = 4 (0x4), region = 106 }
 0x2e7   : > { %s2572_s22 = smov %s2566_s29 }

</bundles_post_ra>
